<compile_context>
chip_gen: v7x
topology: tpu7x:2x2x1
jax: 0.10.0
libtpu: 0.0.40
codegen_flags: <defaults>
</compile_context>

<pallas_src>
import functools

import jax
import jax.numpy as jnp
from jax.experimental import pallas as pl
from jax.experimental.pallas import tpu as pltpu

# ----------------------------- model config (small) -------------------------
B = 2           # batch
S = 8           # seq length
H = 32          # hidden size
NHEAD = 4
DHEAD = H // NHEAD
FFN = 64        # intermediate size
NLAYERS = 2
VOCAB = 64
LAYER_SIZE = 200     # classifier hidden (matches module's self.layer_size)
LAYER_PAD = 256      # lane-dense padding of LAYER_SIZE (zeros beyond 200)
OUT_PAD = 128        # lane-dense padding of the scalar output (col 0 is real)
LN_EPS = 1e-12
LEAKY_SLOPE = 0.01   # nn.LeakyReLU default

_TRANS_B = (((1,), (1,)), ((), ()))   # contract last dims of both: q @ k^T


# ----------------------------- fused kernel ---------------------------------
def bert_fused_kernel(
    emb_ref, bias_ref, emb_ln_g_ref, emb_ln_b_ref,
    wqkv_ref, bqkv_ref, wo_ref, bo_ref, ln1_g_ref, ln1_b_ref,
    w_ffn1_ref, b_ffn1_ref, w_ffn2_ref, b_ffn2_ref, ln2_g_ref, ln2_b_ref,
    head_w1_ref, head_b1_ref, head_w2_ref, head_b2_ref,
    out_ref,
):
    f32 = jnp.float32
    bf16 = jnp.bfloat16

    def layernorm(x, g, b):
        mu = jnp.mean(x, axis=-1, keepdims=True)
        var = jnp.mean((x - mu) * (x - mu), axis=-1, keepdims=True)
        return (x - mu) * jax.lax.rsqrt(var + LN_EPS) * g + b

    # embeddings were summed outside (gather glue); LayerNorm them here.
    x = layernorm(emb_ref[0], emb_ln_g_ref[...], emb_ln_b_ref[...])    # (S, H) f32
    bias = bias_ref[0]                                                 # (1, S) f32
    scale = 1.0 / (DHEAD ** 0.5)

    for l in range(NLAYERS):                       # static unroll (2 layers)
        # ---- self-attention: fused QKV projection (bf16 in, f32 acc) ----
        qkv = jnp.dot(x.astype(bf16), wqkv_ref[l],
                      preferred_element_type=f32) + bqkv_ref[l]        # (S, 3H)
        wo_l = wo_ref[l]                                               # (H, H) bf16
        acc = None
        for h in range(NHEAD):                     # static 4-way head unroll
            q_h = qkv[:, h * DHEAD:(h + 1) * DHEAD]
            k_h = qkv[:, H + h * DHEAD:H + (h + 1) * DHEAD]
            v_h = qkv[:, 2 * H + h * DHEAD:2 * H + (h + 1) * DHEAD]
            s = jax.lax.dot_general(q_h.astype(bf16), k_h.astype(bf16),
                                    _TRANS_B, preferred_element_type=f32)
            s = s * scale + bias                   # additive key mask, (S, S)
            m = jnp.max(s, axis=-1, keepdims=True)
            e = jnp.exp(s - m)
            p = e * pl.reciprocal(jnp.sum(e, axis=-1, keepdims=True),
                                  approx=True)
            ctx_h = jnp.dot(p.astype(bf16), v_h.astype(bf16),
                            preferred_element_type=f32)                # (S, Dh)
            # merge heads via the output projection: ctx @ Wo == sum_h ctx_h @ Wo_h
            part = jnp.dot(ctx_h.astype(bf16),
                           wo_l[h * DHEAD:(h + 1) * DHEAD, :],
                           preferred_element_type=f32)                 # (S, H)
            acc = part if acc is None else acc + part
        attn = acc + bo_ref[l]
        x = layernorm(x + attn, ln1_g_ref[l], ln1_b_ref[l])

        # ---- feed-forward ----
        f = jnp.dot(x.astype(bf16), w_ffn1_ref[l],
                    preferred_element_type=f32) + b_ffn1_ref[l]        # (S, FFN)
        # TODO(synk): HF BERT default is exact erf GELU; tanh approximation used.
        f = jax.nn.gelu(f, approximate=True)
        f = jnp.dot(f.astype(bf16), w_ffn2_ref[l],
                    preferred_element_type=f32) + b_ffn2_ref[l]        # (S, H)
        x = layernorm(x + f, ln2_g_ref[l], ln2_b_ref[l])

    # ---- mean-pool (plain mean over seq, as torch.mean(dim=1)) + head ----
    hm = jnp.mean(x, axis=0, keepdims=True)                            # (1, H)
    z = jnp.dot(hm.astype(bf16), head_w1_ref[...],
                preferred_element_type=f32) + head_b1_ref[...]         # (1, 256)
    z = jnp.where(z > 0, z, LEAKY_SLOPE * z)                           # LeakyReLU
    out = jnp.dot(z.astype(bf16), head_w2_ref[...],
                  preferred_element_type=f32) + head_b2_ref[...]       # (1, 128)
    out_ref[0] = out


# ----------------------------- parameter init --------------------------------
def init_params(key):
    def dense(k, fan_in, fan_out):
        lim = (6.0 / (fan_in + fan_out)) ** 0.5  # xavier-uniform-ish
        w = jax.random.uniform(k, (fan_in, fan_out), jnp.float32, -lim, lim)
        b = jnp.zeros((fan_out,), jnp.float32)
        return w, b

    keys = jax.random.split(key, 32)
    ki = iter(keys)
    bf16 = jnp.bfloat16

    tok_emb = 0.02 * jax.random.normal(next(ki), (VOCAB, H), jnp.float32)
    pos_emb = 0.02 * jax.random.normal(next(ki), (S, H), jnp.float32)
    typ_emb = 0.02 * jax.random.normal(next(ki), (2, H), jnp.float32)

    wqkv, bqkv, wo, bo = [], [], [], []
    w1, b1, w2, b2 = [], [], [], []
    ln1g, ln1b, ln2g, ln2b = [], [], [], []
    for _ in range(NLAYERS):
        wq, bq_ = dense(next(ki), H, H)
        wk, bk_ = dense(next(ki), H, H)
        wv, bv_ = dense(next(ki), H, H)
        wqkv.append(jnp.concatenate([wq, wk, wv], axis=1))        # (H, 3H)
        bqkv.append(jnp.concatenate([bq_, bk_, bv_])[None, :])    # (1, 3H)
        w, b = dense(next(ki), H, H);   wo.append(w); bo.append(b[None, :])
        w, b = dense(next(ki), H, FFN); w1.append(w); b1.append(b[None, :])
        w, b = dense(next(ki), FFN, H); w2.append(w); b2.append(b[None, :])
        ln1g.append(jnp.ones((1, H), jnp.float32))
        ln1b.append(jnp.zeros((1, H), jnp.float32))
        ln2g.append(jnp.ones((1, H), jnp.float32))
        ln2b.append(jnp.zeros((1, H), jnp.float32))

    hw1, hb1 = dense(next(ki), H, LAYER_SIZE)        # (H, 200), (200,)
    hw2, hb2 = dense(next(ki), LAYER_SIZE, 1)        # (200, 1), (1,)
    # zero-pad the classifier head to lane-dense shapes (math unchanged)
    hw1_p = jnp.zeros((H, LAYER_PAD), jnp.float32).at[:, :LAYER_SIZE].set(hw1)
    hb1_p = jnp.zeros((1, LAYER_PAD), jnp.float32).at[:, :LAYER_SIZE].set(hb1[None, :])
    hw2_p = jnp.zeros((LAYER_PAD, OUT_PAD), jnp.float32).at[:LAYER_SIZE, :1].set(hw2)
    hb2_p = jnp.zeros((1, OUT_PAD), jnp.float32).at[:, :1].set(hb2[None, :])

    return dict(
        tok_emb=tok_emb, pos_emb=pos_emb, typ_emb=typ_emb,
        emb_ln_g=jnp.ones((1, H), jnp.float32),
        emb_ln_b=jnp.zeros((1, H), jnp.float32),
        wqkv=jnp.stack(wqkv).astype(bf16), bqkv=jnp.stack(bqkv),
        wo=jnp.stack(wo).astype(bf16), bo=jnp.stack(bo),
        ln1_g=jnp.stack(ln1g), ln1_b=jnp.stack(ln1b),
        w_ffn1=jnp.stack(w1).astype(bf16), b_ffn1=jnp.stack(b1),
        w_ffn2=jnp.stack(w2).astype(bf16), b_ffn2=jnp.stack(b2),
        ln2_g=jnp.stack(ln2g), ln2_b=jnp.stack(ln2b),
        head_w1=hw1_p.astype(bf16), head_b1=hb1_p,
        head_w2=hw2_p.astype(bf16), head_b2=hb2_p,
    )


# ----------------------------- forward ---------------------------------------
def _full_spec(shape):
    nd = len(shape)
    return pl.BlockSpec(shape, lambda b: (0,) * nd)


def forward(params, input_ids, attention_mask):
    # --- embeddings (gather glue in plain JAX) ---
    pos_ids = jnp.arange(S)
    emb = (
        params["tok_emb"][input_ids]            # (B, S, H)
        + params["pos_emb"][pos_ids][None]      # (1, S, H)
        + params["typ_emb"][0][None, None]      # (1, 1, H), token_type_ids == 0
    ).astype(jnp.float32)

    # additive attention bias: 0 where attended, -1e4 where masked
    bias = ((1.0 - attention_mask.astype(jnp.float32)) * -10000.0).reshape(B, 1, S)

    weights = (
        params["emb_ln_g"], params["emb_ln_b"],
        params["wqkv"], params["bqkv"], params["wo"], params["bo"],
        params["ln1_g"], params["ln1_b"],
        params["w_ffn1"], params["b_ffn1"], params["w_ffn2"], params["b_ffn2"],
        params["ln2_g"], params["ln2_b"],
        params["head_w1"], params["head_b1"], params["head_w2"], params["head_b2"],
    )

    in_specs = [
        pl.BlockSpec((1, S, H), lambda b: (b, 0, 0)),   # embeddings, per-batch
        pl.BlockSpec((1, 1, S), lambda b: (b, 0, 0)),   # mask bias, per-batch
    ] + [_full_spec(w.shape) for w in weights]          # weights VMEM-resident

    out = pl.pallas_call(
        bert_fused_kernel,
        out_shape=jax.ShapeDtypeStruct((B, 1, OUT_PAD), jnp.float32),
        grid=(B,),
        in_specs=in_specs,
        out_specs=pl.BlockSpec((1, 1, OUT_PAD), lambda b: (b, 0, 0)),
        compiler_params=pltpu.CompilerParams(
            dimension_semantics=("parallel",)),
    )(emb, bias, *weights)

    # training-mode return value; eval mode would be {'pred': float(out)} for B == 1
    return {"output": out[:, 0, :1]}


# ----------------------------- main ------------------------------------------
if __name__ == "__main__":
    key = jax.random.PRNGKey(0)
    k_param, k_ids = jax.random.split(key)

    params = init_params(k_param)
    input_ids = jax.random.randint(k_ids, (B, S), 0, VOCAB, dtype=jnp.int32)
    attention_mask = jnp.array(
        [[1, 1, 1, 1, 1, 1, 1, 1],
         [1, 1, 1, 1, 1, 0, 0, 0]], dtype=jnp.int32
    )

    result = jax.jit(functools.partial(forward, params))(input_ids, attention_mask)
    out = jax.block_until_ready(result["output"])
    assert out.shape == (B, 1) and out.dtype == jnp.float32
    print("KERNEL_OK")
</pallas_src>

<mosaic_0001>
module attributes {stable_mosaic.version = 11 : i64} {
  func.func @bert_fused_kernel(%arg0: i32, %arg1: memref<1x8x32xf32, #tpu.memory_space<vmem>>, %arg2: memref<1x1x8xf32, #tpu.memory_space<vmem>>, %arg3: memref<1x32xf32, #tpu.memory_space<vmem>>, %arg4: memref<1x32xf32, #tpu.memory_space<vmem>>, %arg5: memref<2x32x96xbf16, #tpu.memory_space<vmem>>, %arg6: memref<2x1x96xf32, #tpu.memory_space<vmem>>, %arg7: memref<2x32x32xbf16, #tpu.memory_space<vmem>>, %arg8: memref<2x1x32xf32, #tpu.memory_space<vmem>>, %arg9: memref<2x1x32xf32, #tpu.memory_space<vmem>>, %arg10: memref<2x1x32xf32, #tpu.memory_space<vmem>>, %arg11: memref<2x32x64xbf16, #tpu.memory_space<vmem>>, %arg12: memref<2x1x64xf32, #tpu.memory_space<vmem>>, %arg13: memref<2x64x32xbf16, #tpu.memory_space<vmem>>, %arg14: memref<2x1x32xf32, #tpu.memory_space<vmem>>, %arg15: memref<2x1x32xf32, #tpu.memory_space<vmem>>, %arg16: memref<2x1x32xf32, #tpu.memory_space<vmem>>, %arg17: memref<32x256xbf16, #tpu.memory_space<vmem>>, %arg18: memref<1x256xf32, #tpu.memory_space<vmem>>, %arg19: memref<256x128xbf16, #tpu.memory_space<vmem>>, %arg20: memref<1x128xf32, #tpu.memory_space<vmem>>, %arg21: memref<1x1x128xf32, #tpu.memory_space<vmem>>) attributes {dimension_semantics = [#tpu.dimension_semantics<parallel>], iteration_bounds = array<i64: 2>, scalar_prefetch = 0 : i64, scratch_operands = 0 : i64, tpu.core_type = #tpu.core_type<tc>, window_params = [{transform_indices = @transform_0, window_bounds = array<i64: 1, 8, 32>}, {transform_indices = @transform_1, window_bounds = array<i64: 1, 1, 8>}, {pipeline_mode = #tpu.pipeline_mode<synchronous>, transform_indices = @transform_2, window_bounds = array<i64: 1, 32>}, {pipeline_mode = #tpu.pipeline_mode<synchronous>, transform_indices = @transform_3, window_bounds = array<i64: 1, 32>}, {pipeline_mode = #tpu.pipeline_mode<synchronous>, transform_indices = @transform_4, window_bounds = array<i64: 2, 32, 96>}, {pipeline_mode = #tpu.pipeline_mode<synchronous>, transform_indices = @transform_5, window_bounds = array<i64: 2, 1, 96>}, {pipeline_mode = #tpu.pipeline_mode<synchronous>, transform_indices = @transform_6, window_bounds = array<i64: 2, 32, 32>}, {pipeline_mode = #tpu.pipeline_mode<synchronous>, transform_indices = @transform_7, window_bounds = array<i64: 2, 1, 32>}, {pipeline_mode = #tpu.pipeline_mode<synchronous>, transform_indices = @transform_8, window_bounds = array<i64: 2, 1, 32>}, {pipeline_mode = #tpu.pipeline_mode<synchronous>, transform_indices = @transform_9, window_bounds = array<i64: 2, 1, 32>}, {pipeline_mode = #tpu.pipeline_mode<synchronous>, transform_indices = @transform_10, window_bounds = array<i64: 2, 32, 64>}, {pipeline_mode = #tpu.pipeline_mode<synchronous>, transform_indices = @transform_11, window_bounds = array<i64: 2, 1, 64>}, {pipeline_mode = #tpu.pipeline_mode<synchronous>, transform_indices = @transform_12, window_bounds = array<i64: 2, 64, 32>}, {pipeline_mode = #tpu.pipeline_mode<synchronous>, transform_indices = @transform_13, window_bounds = array<i64: 2, 1, 32>}, {pipeline_mode = #tpu.pipeline_mode<synchronous>, transform_indices = @transform_14, window_bounds = array<i64: 2, 1, 32>}, {pipeline_mode = #tpu.pipeline_mode<synchronous>, transform_indices = @transform_15, window_bounds = array<i64: 2, 1, 32>}, {pipeline_mode = #tpu.pipeline_mode<synchronous>, transform_indices = @transform_16, window_bounds = array<i64: 32, 256>}, {pipeline_mode = #tpu.pipeline_mode<synchronous>, transform_indices = @transform_17, window_bounds = array<i64: 1, 256>}, {pipeline_mode = #tpu.pipeline_mode<synchronous>, transform_indices = @transform_18, window_bounds = array<i64: 256, 128>}, {pipeline_mode = #tpu.pipeline_mode<synchronous>, transform_indices = @transform_19, window_bounds = array<i64: 1, 128>}, {transform_indices = @transform_20, window_bounds = array<i64: 1, 1, 128>}]} {
    %c0 = arith.constant 0 : index
    %c0_0 = arith.constant 0 : index
    %c0_1 = arith.constant 0 : index
    %0 = vector.load %arg1[%c0, %c0_0, %c0_1] : memref<1x8x32xf32, #tpu.memory_space<vmem>>, vector<1x8x32xf32>
    %1 = vector.shape_cast %0 : vector<1x8x32xf32> to vector<8x32xf32>
    %c0_2 = arith.constant 0 : index
    %c0_3 = arith.constant 0 : index
    %2 = vector.load %arg3[%c0_2, %c0_3] : memref<1x32xf32, #tpu.memory_space<vmem>>, vector<1x32xf32>
    %c0_4 = arith.constant 0 : index
    %c0_5 = arith.constant 0 : index
    %3 = vector.load %arg4[%c0_4, %c0_5] : memref<1x32xf32, #tpu.memory_space<vmem>>, vector<1x32xf32>
    %cst = arith.constant dense<0.000000e+00> : vector<8xf32>
    %4 = vector.multi_reduction <add>, %1, %cst [1] : vector<8x32xf32> to vector<8xf32>
    %5 = vector.shape_cast %4 : vector<8xf32> to vector<8x1xf32>
    %cst_6 = arith.constant 3.200000e+01 : f32
    %6 = vector.broadcast %cst_6 : f32 to vector<8x1xf32>
    %7 = arith.divf %5, %6 : vector<8x1xf32>
    %8 = vector.broadcast %7 : vector<8x1xf32> to vector<8x32xf32>
    %9 = arith.subf %1, %8 : vector<8x32xf32>
    %10 = vector.broadcast %7 : vector<8x1xf32> to vector<8x32xf32>
    %11 = arith.subf %1, %10 : vector<8x32xf32>
    %12 = arith.mulf %9, %11 : vector<8x32xf32>
    %cst_7 = arith.constant dense<0.000000e+00> : vector<8xf32>
    %13 = vector.multi_reduction <add>, %12, %cst_7 [1] : vector<8x32xf32> to vector<8xf32>
    %14 = vector.shape_cast %13 : vector<8xf32> to vector<8x1xf32>
    %cst_8 = arith.constant 3.200000e+01 : f32
    %15 = vector.broadcast %cst_8 : f32 to vector<8x1xf32>
    %16 = arith.divf %14, %15 : vector<8x1xf32>
    %17 = vector.broadcast %7 : vector<8x1xf32> to vector<8x32xf32>
    %18 = arith.subf %1, %17 : vector<8x32xf32>
    %cst_9 = arith.constant 9.99999996E-13 : f32
    %19 = vector.broadcast %cst_9 : f32 to vector<8x1xf32>
    %20 = arith.addf %16, %19 : vector<8x1xf32>
    %21 = math.rsqrt %20 : vector<8x1xf32>
    %22 = vector.broadcast %21 : vector<8x1xf32> to vector<8x32xf32>
    %23 = arith.mulf %18, %22 : vector<8x32xf32>
    %24 = vector.broadcast %2 : vector<1x32xf32> to vector<8x32xf32>
    %25 = arith.mulf %23, %24 : vector<8x32xf32>
    %26 = vector.broadcast %3 : vector<1x32xf32> to vector<8x32xf32>
    %27 = arith.addf %25, %26 : vector<8x32xf32>
    %c0_10 = arith.constant 0 : index
    %c0_11 = arith.constant 0 : index
    %c0_12 = arith.constant 0 : index
    %28 = vector.load %arg2[%c0_10, %c0_11, %c0_12] : memref<1x1x8xf32, #tpu.memory_space<vmem>>, vector<1x1x8xf32>
    %29 = vector.shape_cast %28 : vector<1x1x8xf32> to vector<1x8xf32>
    %30 = arith.truncf %27 : vector<8x32xf32> to vector<8x32xbf16>
    %c0_13 = arith.constant 0 : index
    %c0_14 = arith.constant 0 : index
    %c0_15 = arith.constant 0 : index
    %31 = vector.load %arg5[%c0_13, %c0_14, %c0_15] : memref<2x32x96xbf16, #tpu.memory_space<vmem>>, vector<1x32x96xbf16>
    %32 = vector.shape_cast %31 : vector<1x32x96xbf16> to vector<32x96xbf16>
    %cst_16 = arith.constant dense<0.000000e+00> : vector<8x96xf32>
    %33 = tpu.matmul %30, %32, %cst_16 {dimension_numbers = #tpu.dot_dimension_numbers<[1], [0], [0], [1], [0, 0, 1, 1], [], []>} : vector<8x32xbf16>, vector<32x96xbf16>, vector<8x96xf32> -> vector<8x96xf32>
    %c0_17 = arith.constant 0 : index
    %c0_18 = arith.constant 0 : index
    %c0_19 = arith.constant 0 : index
    %34 = vector.load %arg6[%c0_17, %c0_18, %c0_19] : memref<2x1x96xf32, #tpu.memory_space<vmem>>, vector<1x1x96xf32>
    %35 = vector.shape_cast %34 : vector<1x1x96xf32> to vector<1x96xf32>
    %36 = vector.broadcast %35 : vector<1x96xf32> to vector<8x96xf32>
    %37 = arith.addf %33, %36 : vector<8x96xf32>
    %c0_20 = arith.constant 0 : index
    %c0_21 = arith.constant 0 : index
    %c0_22 = arith.constant 0 : index
    %38 = vector.load %arg7[%c0_20, %c0_21, %c0_22] : memref<2x32x32xbf16, #tpu.memory_space<vmem>>, vector<1x32x32xbf16>
    %39 = vector.shape_cast %38 : vector<1x32x32xbf16> to vector<32x32xbf16>
    %40 = vector.extract_strided_slice %37 {offsets = [0, 0], sizes = [8, 8], strides = [1, 1]} : vector<8x96xf32> to vector<8x8xf32>
    %41 = vector.extract_strided_slice %37 {offsets = [0, 32], sizes = [8, 8], strides = [1, 1]} : vector<8x96xf32> to vector<8x8xf32>
    %42 = vector.extract_strided_slice %37 {offsets = [0, 64], sizes = [8, 8], strides = [1, 1]} : vector<8x96xf32> to vector<8x8xf32>
    %43 = arith.truncf %40 : vector<8x8xf32> to vector<8x8xbf16>
    %44 = arith.truncf %41 : vector<8x8xf32> to vector<8x8xbf16>
    %cst_23 = arith.constant dense<0.000000e+00> : vector<8x8xf32>
    %45 = tpu.matmul %43, %44, %cst_23 {dimension_numbers = #tpu.dot_dimension_numbers<[1], [1], [0], [0], [0, 0, 1, 0], [], []>} : vector<8x8xbf16>, vector<8x8xbf16>, vector<8x8xf32> -> vector<8x8xf32>
    %cst_24 = arith.constant 0.353553385 : f32
    %46 = vector.broadcast %cst_24 : f32 to vector<8x8xf32>
    %47 = arith.mulf %45, %46 : vector<8x8xf32>
    %48 = vector.broadcast %29 : vector<1x8xf32> to vector<8x8xf32>
    %49 = arith.addf %47, %48 : vector<8x8xf32>
    %cst_25 = arith.constant dense<0xFF800000> : vector<8xf32>
    %50 = vector.multi_reduction <maximumf>, %49, %cst_25 [1] : vector<8x8xf32> to vector<8xf32>
    %51 = vector.shape_cast %50 : vector<8xf32> to vector<8x1xf32>
    %52 = vector.broadcast %51 : vector<8x1xf32> to vector<8x8xf32>
    %53 = arith.subf %49, %52 : vector<8x8xf32>
    %54 = math.exp %53 : vector<8x8xf32>
    %cst_26 = arith.constant dense<0.000000e+00> : vector<8xf32>
    %55 = vector.multi_reduction <add>, %54, %cst_26 [1] : vector<8x8xf32> to vector<8xf32>
    %56 = vector.shape_cast %55 : vector<8xf32> to vector<8x1xf32>
    %57 = tpu.reciprocal %56 {approx = true} : vector<8x1xf32> -> vector<8x1xf32>
    %58 = vector.broadcast %57 : vector<8x1xf32> to vector<8x8xf32>
    %59 = arith.mulf %54, %58 : vector<8x8xf32>
    %60 = arith.truncf %59 : vector<8x8xf32> to vector<8x8xbf16>
    %61 = arith.truncf %42 : vector<8x8xf32> to vector<8x8xbf16>
    %cst_27 = arith.constant dense<0.000000e+00> : vector<8x8xf32>
    %62 = tpu.matmul %60, %61, %cst_27 {dimension_numbers = #tpu.dot_dimension_numbers<[1], [0], [0], [1], [0, 0, 1, 1], [], []>} : vector<8x8xbf16>, vector<8x8xbf16>, vector<8x8xf32> -> vector<8x8xf32>
    %63 = arith.truncf %62 : vector<8x8xf32> to vector<8x8xbf16>
    %64 = vector.extract_strided_slice %39 {offsets = [0, 0], sizes = [8, 32], strides = [1, 1]} : vector<32x32xbf16> to vector<8x32xbf16>
    %cst_28 = arith.constant dense<0.000000e+00> : vector<8x32xf32>
    %65 = tpu.matmul %63, %64, %cst_28 {dimension_numbers = #tpu.dot_dimension_numbers<[1], [0], [0], [1], [0, 0, 1, 1], [], []>} : vector<8x8xbf16>, vector<8x32xbf16>, vector<8x32xf32> -> vector<8x32xf32>
    %66 = vector.extract_strided_slice %37 {offsets = [0, 8], sizes = [8, 8], strides = [1, 1]} : vector<8x96xf32> to vector<8x8xf32>
    %67 = vector.extract_strided_slice %37 {offsets = [0, 40], sizes = [8, 8], strides = [1, 1]} : vector<8x96xf32> to vector<8x8xf32>
    %68 = vector.extract_strided_slice %37 {offsets = [0, 72], sizes = [8, 8], strides = [1, 1]} : vector<8x96xf32> to vector<8x8xf32>
    %69 = arith.truncf %66 : vector<8x8xf32> to vector<8x8xbf16>
    %70 = arith.truncf %67 : vector<8x8xf32> to vector<8x8xbf16>
    %cst_29 = arith.constant dense<0.000000e+00> : vector<8x8xf32>
    %71 = tpu.matmul %69, %70, %cst_29 {dimension_numbers = #tpu.dot_dimension_numbers<[1], [1], [0], [0], [0, 0, 1, 0], [], []>} : vector<8x8xbf16>, vector<8x8xbf16>, vector<8x8xf32> -> vector<8x8xf32>
    %cst_30 = arith.constant 0.353553385 : f32
    %72 = vector.broadcast %cst_30 : f32 to vector<8x8xf32>
    %73 = arith.mulf %71, %72 : vector<8x8xf32>
    %74 = vector.broadcast %29 : vector<1x8xf32> to vector<8x8xf32>
    %75 = arith.addf %73, %74 : vector<8x8xf32>
    %cst_31 = arith.constant dense<0xFF800000> : vector<8xf32>
    %76 = vector.multi_reduction <maximumf>, %75, %cst_31 [1] : vector<8x8xf32> to vector<8xf32>
    %77 = vector.shape_cast %76 : vector<8xf32> to vector<8x1xf32>
    %78 = vector.broadcast %77 : vector<8x1xf32> to vector<8x8xf32>
    %79 = arith.subf %75, %78 : vector<8x8xf32>
    %80 = math.exp %79 : vector<8x8xf32>
    %cst_32 = arith.constant dense<0.000000e+00> : vector<8xf32>
    %81 = vector.multi_reduction <add>, %80, %cst_32 [1] : vector<8x8xf32> to vector<8xf32>
    %82 = vector.shape_cast %81 : vector<8xf32> to vector<8x1xf32>
    %83 = tpu.reciprocal %82 {approx = true} : vector<8x1xf32> -> vector<8x1xf32>
    %84 = vector.broadcast %83 : vector<8x1xf32> to vector<8x8xf32>
    %85 = arith.mulf %80, %84 : vector<8x8xf32>
    %86 = arith.truncf %85 : vector<8x8xf32> to vector<8x8xbf16>
    %87 = arith.truncf %68 : vector<8x8xf32> to vector<8x8xbf16>
    %cst_33 = arith.constant dense<0.000000e+00> : vector<8x8xf32>
    %88 = tpu.matmul %86, %87, %cst_33 {dimension_numbers = #tpu.dot_dimension_numbers<[1], [0], [0], [1], [0, 0, 1, 1], [], []>} : vector<8x8xbf16>, vector<8x8xbf16>, vector<8x8xf32> -> vector<8x8xf32>
    %89 = arith.truncf %88 : vector<8x8xf32> to vector<8x8xbf16>
    %90 = vector.extract_strided_slice %39 {offsets = [8, 0], sizes = [8, 32], strides = [1, 1]} : vector<32x32xbf16> to vector<8x32xbf16>
    %cst_34 = arith.constant dense<0.000000e+00> : vector<8x32xf32>
    %91 = tpu.matmul %89, %90, %cst_34 {dimension_numbers = #tpu.dot_dimension_numbers<[1], [0], [0], [1], [0, 0, 1, 1], [], []>} : vector<8x8xbf16>, vector<8x32xbf16>, vector<8x32xf32> -> vector<8x32xf32>
    %92 = arith.addf %65, %91 : vector<8x32xf32>
    %93 = vector.extract_strided_slice %37 {offsets = [0, 16], sizes = [8, 8], strides = [1, 1]} : vector<8x96xf32> to vector<8x8xf32>
    %94 = vector.extract_strided_slice %37 {offsets = [0, 48], sizes = [8, 8], strides = [1, 1]} : vector<8x96xf32> to vector<8x8xf32>
    %95 = vector.extract_strided_slice %37 {offsets = [0, 80], sizes = [8, 8], strides = [1, 1]} : vector<8x96xf32> to vector<8x8xf32>
    %96 = arith.truncf %93 : vector<8x8xf32> to vector<8x8xbf16>
    %97 = arith.truncf %94 : vector<8x8xf32> to vector<8x8xbf16>
    %cst_35 = arith.constant dense<0.000000e+00> : vector<8x8xf32>
    %98 = tpu.matmul %96, %97, %cst_35 {dimension_numbers = #tpu.dot_dimension_numbers<[1], [1], [0], [0], [0, 0, 1, 0], [], []>} : vector<8x8xbf16>, vector<8x8xbf16>, vector<8x8xf32> -> vector<8x8xf32>
    %cst_36 = arith.constant 0.353553385 : f32
    %99 = vector.broadcast %cst_36 : f32 to vector<8x8xf32>
    %100 = arith.mulf %98, %99 : vector<8x8xf32>
    %101 = vector.broadcast %29 : vector<1x8xf32> to vector<8x8xf32>
    %102 = arith.addf %100, %101 : vector<8x8xf32>
    %cst_37 = arith.constant dense<0xFF800000> : vector<8xf32>
    %103 = vector.multi_reduction <maximumf>, %102, %cst_37 [1] : vector<8x8xf32> to vector<8xf32>
    %104 = vector.shape_cast %103 : vector<8xf32> to vector<8x1xf32>
    %105 = vector.broadcast %104 : vector<8x1xf32> to vector<8x8xf32>
    %106 = arith.subf %102, %105 : vector<8x8xf32>
    %107 = math.exp %106 : vector<8x8xf32>
    %cst_38 = arith.constant dense<0.000000e+00> : vector<8xf32>
    %108 = vector.multi_reduction <add>, %107, %cst_38 [1] : vector<8x8xf32> to vector<8xf32>
    %109 = vector.shape_cast %108 : vector<8xf32> to vector<8x1xf32>
    %110 = tpu.reciprocal %109 {approx = true} : vector<8x1xf32> -> vector<8x1xf32>
    %111 = vector.broadcast %110 : vector<8x1xf32> to vector<8x8xf32>
    %112 = arith.mulf %107, %111 : vector<8x8xf32>
    %113 = arith.truncf %112 : vector<8x8xf32> to vector<8x8xbf16>
    %114 = arith.truncf %95 : vector<8x8xf32> to vector<8x8xbf16>
    %cst_39 = arith.constant dense<0.000000e+00> : vector<8x8xf32>
    %115 = tpu.matmul %113, %114, %cst_39 {dimension_numbers = #tpu.dot_dimension_numbers<[1], [0], [0], [1], [0, 0, 1, 1], [], []>} : vector<8x8xbf16>, vector<8x8xbf16>, vector<8x8xf32> -> vector<8x8xf32>
    %116 = arith.truncf %115 : vector<8x8xf32> to vector<8x8xbf16>
    %117 = vector.extract_strided_slice %39 {offsets = [16, 0], sizes = [8, 32], strides = [1, 1]} : vector<32x32xbf16> to vector<8x32xbf16>
    %cst_40 = arith.constant dense<0.000000e+00> : vector<8x32xf32>
    %118 = tpu.matmul %116, %117, %cst_40 {dimension_numbers = #tpu.dot_dimension_numbers<[1], [0], [0], [1], [0, 0, 1, 1], [], []>} : vector<8x8xbf16>, vector<8x32xbf16>, vector<8x32xf32> -> vector<8x32xf32>
    %119 = arith.addf %92, %118 : vector<8x32xf32>
    %120 = vector.extract_strided_slice %37 {offsets = [0, 24], sizes = [8, 8], strides = [1, 1]} : vector<8x96xf32> to vector<8x8xf32>
    %121 = vector.extract_strided_slice %37 {offsets = [0, 56], sizes = [8, 8], strides = [1, 1]} : vector<8x96xf32> to vector<8x8xf32>
    %122 = vector.extract_strided_slice %37 {offsets = [0, 88], sizes = [8, 8], strides = [1, 1]} : vector<8x96xf32> to vector<8x8xf32>
    %123 = arith.truncf %120 : vector<8x8xf32> to vector<8x8xbf16>
    %124 = arith.truncf %121 : vector<8x8xf32> to vector<8x8xbf16>
    %cst_41 = arith.constant dense<0.000000e+00> : vector<8x8xf32>
    %125 = tpu.matmul %123, %124, %cst_41 {dimension_numbers = #tpu.dot_dimension_numbers<[1], [1], [0], [0], [0, 0, 1, 0], [], []>} : vector<8x8xbf16>, vector<8x8xbf16>, vector<8x8xf32> -> vector<8x8xf32>
    %cst_42 = arith.constant 0.353553385 : f32
    %126 = vector.broadcast %cst_42 : f32 to vector<8x8xf32>
    %127 = arith.mulf %125, %126 : vector<8x8xf32>
    %128 = vector.broadcast %29 : vector<1x8xf32> to vector<8x8xf32>
    %129 = arith.addf %127, %128 : vector<8x8xf32>
    %cst_43 = arith.constant dense<0xFF800000> : vector<8xf32>
    %130 = vector.multi_reduction <maximumf>, %129, %cst_43 [1] : vector<8x8xf32> to vector<8xf32>
    %131 = vector.shape_cast %130 : vector<8xf32> to vector<8x1xf32>
    %132 = vector.broadcast %131 : vector<8x1xf32> to vector<8x8xf32>
    %133 = arith.subf %129, %132 : vector<8x8xf32>
    %134 = math.exp %133 : vector<8x8xf32>
    %cst_44 = arith.constant dense<0.000000e+00> : vector<8xf32>
    %135 = vector.multi_reduction <add>, %134, %cst_44 [1] : vector<8x8xf32> to vector<8xf32>
    %136 = vector.shape_cast %135 : vector<8xf32> to vector<8x1xf32>
    %137 = tpu.reciprocal %136 {approx = true} : vector<8x1xf32> -> vector<8x1xf32>
    %138 = vector.broadcast %137 : vector<8x1xf32> to vector<8x8xf32>
    %139 = arith.mulf %134, %138 : vector<8x8xf32>
    %140 = arith.truncf %139 : vector<8x8xf32> to vector<8x8xbf16>
    %141 = arith.truncf %122 : vector<8x8xf32> to vector<8x8xbf16>
    %cst_45 = arith.constant dense<0.000000e+00> : vector<8x8xf32>
    %142 = tpu.matmul %140, %141, %cst_45 {dimension_numbers = #tpu.dot_dimension_numbers<[1], [0], [0], [1], [0, 0, 1, 1], [], []>} : vector<8x8xbf16>, vector<8x8xbf16>, vector<8x8xf32> -> vector<8x8xf32>
    %143 = arith.truncf %142 : vector<8x8xf32> to vector<8x8xbf16>
    %144 = vector.extract_strided_slice %39 {offsets = [24, 0], sizes = [8, 32], strides = [1, 1]} : vector<32x32xbf16> to vector<8x32xbf16>
    %cst_46 = arith.constant dense<0.000000e+00> : vector<8x32xf32>
    %145 = tpu.matmul %143, %144, %cst_46 {dimension_numbers = #tpu.dot_dimension_numbers<[1], [0], [0], [1], [0, 0, 1, 1], [], []>} : vector<8x8xbf16>, vector<8x32xbf16>, vector<8x32xf32> -> vector<8x32xf32>
    %146 = arith.addf %119, %145 : vector<8x32xf32>
    %c0_47 = arith.constant 0 : index
    %c0_48 = arith.constant 0 : index
    %c0_49 = arith.constant 0 : index
    %147 = vector.load %arg8[%c0_47, %c0_48, %c0_49] : memref<2x1x32xf32, #tpu.memory_space<vmem>>, vector<1x1x32xf32>
    %148 = vector.shape_cast %147 : vector<1x1x32xf32> to vector<1x32xf32>
    %149 = vector.broadcast %148 : vector<1x32xf32> to vector<8x32xf32>
    %150 = arith.addf %146, %149 : vector<8x32xf32>
    %151 = arith.addf %27, %150 : vector<8x32xf32>
    %c0_50 = arith.constant 0 : index
    %c0_51 = arith.constant 0 : index
    %c0_52 = arith.constant 0 : index
    %152 = vector.load %arg9[%c0_50, %c0_51, %c0_52] : memref<2x1x32xf32, #tpu.memory_space<vmem>>, vector<1x1x32xf32>
    %153 = vector.shape_cast %152 : vector<1x1x32xf32> to vector<1x32xf32>
    %c0_53 = arith.constant 0 : index
    %c0_54 = arith.constant 0 : index
    %c0_55 = arith.constant 0 : index
    %154 = vector.load %arg10[%c0_53, %c0_54, %c0_55] : memref<2x1x32xf32, #tpu.memory_space<vmem>>, vector<1x1x32xf32>
    %155 = vector.shape_cast %154 : vector<1x1x32xf32> to vector<1x32xf32>
    %cst_56 = arith.constant dense<0.000000e+00> : vector<8xf32>
    %156 = vector.multi_reduction <add>, %151, %cst_56 [1] : vector<8x32xf32> to vector<8xf32>
    %157 = vector.shape_cast %156 : vector<8xf32> to vector<8x1xf32>
    %cst_57 = arith.constant 3.200000e+01 : f32
    %158 = vector.broadcast %cst_57 : f32 to vector<8x1xf32>
    %159 = arith.divf %157, %158 : vector<8x1xf32>
    %160 = vector.broadcast %159 : vector<8x1xf32> to vector<8x32xf32>
    %161 = arith.subf %151, %160 : vector<8x32xf32>
    %162 = vector.broadcast %159 : vector<8x1xf32> to vector<8x32xf32>
    %163 = arith.subf %151, %162 : vector<8x32xf32>
    %164 = arith.mulf %161, %163 : vector<8x32xf32>
    %cst_58 = arith.constant dense<0.000000e+00> : vector<8xf32>
    %165 = vector.multi_reduction <add>, %164, %cst_58 [1] : vector<8x32xf32> to vector<8xf32>
    %166 = vector.shape_cast %165 : vector<8xf32> to vector<8x1xf32>
    %cst_59 = arith.constant 3.200000e+01 : f32
    %167 = vector.broadcast %cst_59 : f32 to vector<8x1xf32>
    %168 = arith.divf %166, %167 : vector<8x1xf32>
    %169 = vector.broadcast %159 : vector<8x1xf32> to vector<8x32xf32>
    %170 = arith.subf %151, %169 : vector<8x32xf32>
    %cst_60 = arith.constant 9.99999996E-13 : f32
    %171 = vector.broadcast %cst_60 : f32 to vector<8x1xf32>
    %172 = arith.addf %168, %171 : vector<8x1xf32>
    %173 = math.rsqrt %172 : vector<8x1xf32>
    %174 = vector.broadcast %173 : vector<8x1xf32> to vector<8x32xf32>
    %175 = arith.mulf %170, %174 : vector<8x32xf32>
    %176 = vector.broadcast %153 : vector<1x32xf32> to vector<8x32xf32>
    %177 = arith.mulf %175, %176 : vector<8x32xf32>
    %178 = vector.broadcast %155 : vector<1x32xf32> to vector<8x32xf32>
    %179 = arith.addf %177, %178 : vector<8x32xf32>
    %180 = arith.truncf %179 : vector<8x32xf32> to vector<8x32xbf16>
    %c0_61 = arith.constant 0 : index
    %c0_62 = arith.constant 0 : index
    %c0_63 = arith.constant 0 : index
    %181 = vector.load %arg11[%c0_61, %c0_62, %c0_63] : memref<2x32x64xbf16, #tpu.memory_space<vmem>>, vector<1x32x64xbf16>
    %182 = vector.shape_cast %181 : vector<1x32x64xbf16> to vector<32x64xbf16>
    %cst_64 = arith.constant dense<0.000000e+00> : vector<8x64xf32>
    %183 = tpu.matmul %180, %182, %cst_64 {dimension_numbers = #tpu.dot_dimension_numbers<[1], [0], [0], [1], [0, 0, 1, 1], [], []>} : vector<8x32xbf16>, vector<32x64xbf16>, vector<8x64xf32> -> vector<8x64xf32>
    %c0_65 = arith.constant 0 : index
    %c0_66 = arith.constant 0 : index
    %c0_67 = arith.constant 0 : index
    %184 = vector.load %arg12[%c0_65, %c0_66, %c0_67] : memref<2x1x64xf32, #tpu.memory_space<vmem>>, vector<1x1x64xf32>
    %185 = vector.shape_cast %184 : vector<1x1x64xf32> to vector<1x64xf32>
    %186 = vector.broadcast %185 : vector<1x64xf32> to vector<8x64xf32>
    %187 = arith.addf %183, %186 : vector<8x64xf32>
    %188 = arith.mulf %187, %187 : vector<8x64xf32>
    %189 = arith.mulf %187, %188 : vector<8x64xf32>
    %cst_68 = arith.constant 4.471500e-02 : f32
    %190 = vector.broadcast %cst_68 : f32 to vector<8x64xf32>
    %191 = arith.mulf %190, %189 : vector<8x64xf32>
    %192 = arith.addf %187, %191 : vector<8x64xf32>
    %cst_69 = arith.constant 0.797884583 : f32
    %193 = vector.broadcast %cst_69 : f32 to vector<8x64xf32>
    %194 = arith.mulf %193, %192 : vector<8x64xf32>
    %195 = math.tanh %194 : vector<8x64xf32>
    %cst_70 = arith.constant 1.000000e+00 : f32
    %196 = vector.broadcast %cst_70 : f32 to vector<8x64xf32>
    %197 = arith.addf %196, %195 : vector<8x64xf32>
    %cst_71 = arith.constant 5.000000e-01 : f32
    %198 = vector.broadcast %cst_71 : f32 to vector<8x64xf32>
    %199 = arith.mulf %198, %197 : vector<8x64xf32>
    %200 = arith.mulf %187, %199 : vector<8x64xf32>
    %201 = arith.truncf %200 : vector<8x64xf32> to vector<8x64xbf16>
    %c0_72 = arith.constant 0 : index
    %c0_73 = arith.constant 0 : index
    %c0_74 = arith.constant 0 : index
    %202 = vector.load %arg13[%c0_72, %c0_73, %c0_74] : memref<2x64x32xbf16, #tpu.memory_space<vmem>>, vector<1x64x32xbf16>
    %203 = vector.shape_cast %202 : vector<1x64x32xbf16> to vector<64x32xbf16>
    %cst_75 = arith.constant dense<0.000000e+00> : vector<8x32xf32>
    %204 = tpu.matmul %201, %203, %cst_75 {dimension_numbers = #tpu.dot_dimension_numbers<[1], [0], [0], [1], [0, 0, 1, 1], [], []>} : vector<8x64xbf16>, vector<64x32xbf16>, vector<8x32xf32> -> vector<8x32xf32>
    %c0_76 = arith.constant 0 : index
    %c0_77 = arith.constant 0 : index
    %c0_78 = arith.constant 0 : index
    %205 = vector.load %arg14[%c0_76, %c0_77, %c0_78] : memref<2x1x32xf32, #tpu.memory_space<vmem>>, vector<1x1x32xf32>
    %206 = vector.shape_cast %205 : vector<1x1x32xf32> to vector<1x32xf32>
    %207 = vector.broadcast %206 : vector<1x32xf32> to vector<8x32xf32>
    %208 = arith.addf %204, %207 : vector<8x32xf32>
    %209 = arith.addf %179, %208 : vector<8x32xf32>
    %c0_79 = arith.constant 0 : index
    %c0_80 = arith.constant 0 : index
    %c0_81 = arith.constant 0 : index
    %210 = vector.load %arg15[%c0_79, %c0_80, %c0_81] : memref<2x1x32xf32, #tpu.memory_space<vmem>>, vector<1x1x32xf32>
    %211 = vector.shape_cast %210 : vector<1x1x32xf32> to vector<1x32xf32>
    %c0_82 = arith.constant 0 : index
    %c0_83 = arith.constant 0 : index
    %c0_84 = arith.constant 0 : index
    %212 = vector.load %arg16[%c0_82, %c0_83, %c0_84] : memref<2x1x32xf32, #tpu.memory_space<vmem>>, vector<1x1x32xf32>
    %213 = vector.shape_cast %212 : vector<1x1x32xf32> to vector<1x32xf32>
    %cst_85 = arith.constant dense<0.000000e+00> : vector<8xf32>
    %214 = vector.multi_reduction <add>, %209, %cst_85 [1] : vector<8x32xf32> to vector<8xf32>
    %215 = vector.shape_cast %214 : vector<8xf32> to vector<8x1xf32>
    %cst_86 = arith.constant 3.200000e+01 : f32
    %216 = vector.broadcast %cst_86 : f32 to vector<8x1xf32>
    %217 = arith.divf %215, %216 : vector<8x1xf32>
    %218 = vector.broadcast %217 : vector<8x1xf32> to vector<8x32xf32>
    %219 = arith.subf %209, %218 : vector<8x32xf32>
    %220 = vector.broadcast %217 : vector<8x1xf32> to vector<8x32xf32>
    %221 = arith.subf %209, %220 : vector<8x32xf32>
    %222 = arith.mulf %219, %221 : vector<8x32xf32>
    %cst_87 = arith.constant dense<0.000000e+00> : vector<8xf32>
    %223 = vector.multi_reduction <add>, %222, %cst_87 [1] : vector<8x32xf32> to vector<8xf32>
    %224 = vector.shape_cast %223 : vector<8xf32> to vector<8x1xf32>
    %cst_88 = arith.constant 3.200000e+01 : f32
    %225 = vector.broadcast %cst_88 : f32 to vector<8x1xf32>
    %226 = arith.divf %224, %225 : vector<8x1xf32>
    %227 = vector.broadcast %217 : vector<8x1xf32> to vector<8x32xf32>
    %228 = arith.subf %209, %227 : vector<8x32xf32>
    %cst_89 = arith.constant 9.99999996E-13 : f32
    %229 = vector.broadcast %cst_89 : f32 to vector<8x1xf32>
    %230 = arith.addf %226, %229 : vector<8x1xf32>
    %231 = math.rsqrt %230 : vector<8x1xf32>
    %232 = vector.broadcast %231 : vector<8x1xf32> to vector<8x32xf32>
    %233 = arith.mulf %228, %232 : vector<8x32xf32>
    %234 = vector.broadcast %211 : vector<1x32xf32> to vector<8x32xf32>
    %235 = arith.mulf %233, %234 : vector<8x32xf32>
    %236 = vector.broadcast %213 : vector<1x32xf32> to vector<8x32xf32>
    %237 = arith.addf %235, %236 : vector<8x32xf32>
    %238 = arith.truncf %237 : vector<8x32xf32> to vector<8x32xbf16>
    %c1 = arith.constant 1 : index
    %c0_90 = arith.constant 0 : index
    %c0_91 = arith.constant 0 : index
    %239 = vector.load %arg5[%c1, %c0_90, %c0_91] : memref<2x32x96xbf16, #tpu.memory_space<vmem>>, vector<1x32x96xbf16>
    %240 = vector.shape_cast %239 : vector<1x32x96xbf16> to vector<32x96xbf16>
    %cst_92 = arith.constant dense<0.000000e+00> : vector<8x96xf32>
    %241 = tpu.matmul %238, %240, %cst_92 {dimension_numbers = #tpu.dot_dimension_numbers<[1], [0], [0], [1], [0, 0, 1, 1], [], []>} : vector<8x32xbf16>, vector<32x96xbf16>, vector<8x96xf32> -> vector<8x96xf32>
    %c1_93 = arith.constant 1 : index
    %c0_94 = arith.constant 0 : index
    %c0_95 = arith.constant 0 : index
    %242 = vector.load %arg6[%c1_93, %c0_94, %c0_95] : memref<2x1x96xf32, #tpu.memory_space<vmem>>, vector<1x1x96xf32>
    %243 = vector.shape_cast %242 : vector<1x1x96xf32> to vector<1x96xf32>
    %244 = vector.broadcast %243 : vector<1x96xf32> to vector<8x96xf32>
    %245 = arith.addf %241, %244 : vector<8x96xf32>
    %c1_96 = arith.constant 1 : index
    %c0_97 = arith.constant 0 : index
    %c0_98 = arith.constant 0 : index
    %246 = vector.load %arg7[%c1_96, %c0_97, %c0_98] : memref<2x32x32xbf16, #tpu.memory_space<vmem>>, vector<1x32x32xbf16>
    %247 = vector.shape_cast %246 : vector<1x32x32xbf16> to vector<32x32xbf16>
    %248 = vector.extract_strided_slice %245 {offsets = [0, 0], sizes = [8, 8], strides = [1, 1]} : vector<8x96xf32> to vector<8x8xf32>
    %249 = vector.extract_strided_slice %245 {offsets = [0, 32], sizes = [8, 8], strides = [1, 1]} : vector<8x96xf32> to vector<8x8xf32>
    %250 = vector.extract_strided_slice %245 {offsets = [0, 64], sizes = [8, 8], strides = [1, 1]} : vector<8x96xf32> to vector<8x8xf32>
    %251 = arith.truncf %248 : vector<8x8xf32> to vector<8x8xbf16>
    %252 = arith.truncf %249 : vector<8x8xf32> to vector<8x8xbf16>
    %cst_99 = arith.constant dense<0.000000e+00> : vector<8x8xf32>
    %253 = tpu.matmul %251, %252, %cst_99 {dimension_numbers = #tpu.dot_dimension_numbers<[1], [1], [0], [0], [0, 0, 1, 0], [], []>} : vector<8x8xbf16>, vector<8x8xbf16>, vector<8x8xf32> -> vector<8x8xf32>
    %cst_100 = arith.constant 0.353553385 : f32
    %254 = vector.broadcast %cst_100 : f32 to vector<8x8xf32>
    %255 = arith.mulf %253, %254 : vector<8x8xf32>
    %256 = vector.broadcast %29 : vector<1x8xf32> to vector<8x8xf32>
    %257 = arith.addf %255, %256 : vector<8x8xf32>
    %cst_101 = arith.constant dense<0xFF800000> : vector<8xf32>
    %258 = vector.multi_reduction <maximumf>, %257, %cst_101 [1] : vector<8x8xf32> to vector<8xf32>
    %259 = vector.shape_cast %258 : vector<8xf32> to vector<8x1xf32>
    %260 = vector.broadcast %259 : vector<8x1xf32> to vector<8x8xf32>
    %261 = arith.subf %257, %260 : vector<8x8xf32>
    %262 = math.exp %261 : vector<8x8xf32>
    %cst_102 = arith.constant dense<0.000000e+00> : vector<8xf32>
    %263 = vector.multi_reduction <add>, %262, %cst_102 [1] : vector<8x8xf32> to vector<8xf32>
    %264 = vector.shape_cast %263 : vector<8xf32> to vector<8x1xf32>
    %265 = tpu.reciprocal %264 {approx = true} : vector<8x1xf32> -> vector<8x1xf32>
    %266 = vector.broadcast %265 : vector<8x1xf32> to vector<8x8xf32>
    %267 = arith.mulf %262, %266 : vector<8x8xf32>
    %268 = arith.truncf %267 : vector<8x8xf32> to vector<8x8xbf16>
    %269 = arith.truncf %250 : vector<8x8xf32> to vector<8x8xbf16>
    %cst_103 = arith.constant dense<0.000000e+00> : vector<8x8xf32>
    %270 = tpu.matmul %268, %269, %cst_103 {dimension_numbers = #tpu.dot_dimension_numbers<[1], [0], [0], [1], [0, 0, 1, 1], [], []>} : vector<8x8xbf16>, vector<8x8xbf16>, vector<8x8xf32> -> vector<8x8xf32>
    %271 = arith.truncf %270 : vector<8x8xf32> to vector<8x8xbf16>
    %272 = vector.extract_strided_slice %247 {offsets = [0, 0], sizes = [8, 32], strides = [1, 1]} : vector<32x32xbf16> to vector<8x32xbf16>
    %cst_104 = arith.constant dense<0.000000e+00> : vector<8x32xf32>
    %273 = tpu.matmul %271, %272, %cst_104 {dimension_numbers = #tpu.dot_dimension_numbers<[1], [0], [0], [1], [0, 0, 1, 1], [], []>} : vector<8x8xbf16>, vector<8x32xbf16>, vector<8x32xf32> -> vector<8x32xf32>
    %274 = vector.extract_strided_slice %245 {offsets = [0, 8], sizes = [8, 8], strides = [1, 1]} : vector<8x96xf32> to vector<8x8xf32>
    %275 = vector.extract_strided_slice %245 {offsets = [0, 40], sizes = [8, 8], strides = [1, 1]} : vector<8x96xf32> to vector<8x8xf32>
    %276 = vector.extract_strided_slice %245 {offsets = [0, 72], sizes = [8, 8], strides = [1, 1]} : vector<8x96xf32> to vector<8x8xf32>
    %277 = arith.truncf %274 : vector<8x8xf32> to vector<8x8xbf16>
    %278 = arith.truncf %275 : vector<8x8xf32> to vector<8x8xbf16>
    %cst_105 = arith.constant dense<0.000000e+00> : vector<8x8xf32>
    %279 = tpu.matmul %277, %278, %cst_105 {dimension_numbers = #tpu.dot_dimension_numbers<[1], [1], [0], [0], [0, 0, 1, 0], [], []>} : vector<8x8xbf16>, vector<8x8xbf16>, vector<8x8xf32> -> vector<8x8xf32>
    %cst_106 = arith.constant 0.353553385 : f32
    %280 = vector.broadcast %cst_106 : f32 to vector<8x8xf32>
    %281 = arith.mulf %279, %280 : vector<8x8xf32>
    %282 = vector.broadcast %29 : vector<1x8xf32> to vector<8x8xf32>
    %283 = arith.addf %281, %282 : vector<8x8xf32>
    %cst_107 = arith.constant dense<0xFF800000> : vector<8xf32>
    %284 = vector.multi_reduction <maximumf>, %283, %cst_107 [1] : vector<8x8xf32> to vector<8xf32>
    %285 = vector.shape_cast %284 : vector<8xf32> to vector<8x1xf32>
    %286 = vector.broadcast %285 : vector<8x1xf32> to vector<8x8xf32>
    %287 = arith.subf %283, %286 : vector<8x8xf32>
    %288 = math.exp %287 : vector<8x8xf32>
    %cst_108 = arith.constant dense<0.000000e+00> : vector<8xf32>
    %289 = vector.multi_reduction <add>, %288, %cst_108 [1] : vector<8x8xf32> to vector<8xf32>
    %290 = vector.shape_cast %289 : vector<8xf32> to vector<8x1xf32>
    %291 = tpu.reciprocal %290 {approx = true} : vector<8x1xf32> -> vector<8x1xf32>
    %292 = vector.broadcast %291 : vector<8x1xf32> to vector<8x8xf32>
    %293 = arith.mulf %288, %292 : vector<8x8xf32>
    %294 = arith.truncf %293 : vector<8x8xf32> to vector<8x8xbf16>
    %295 = arith.truncf %276 : vector<8x8xf32> to vector<8x8xbf16>
    %cst_109 = arith.constant dense<0.000000e+00> : vector<8x8xf32>
    %296 = tpu.matmul %294, %295, %cst_109 {dimension_numbers = #tpu.dot_dimension_numbers<[1], [0], [0], [1], [0, 0, 1, 1], [], []>} : vector<8x8xbf16>, vector<8x8xbf16>, vector<8x8xf32> -> vector<8x8xf32>
    %297 = arith.truncf %296 : vector<8x8xf32> to vector<8x8xbf16>
    %298 = vector.extract_strided_slice %247 {offsets = [8, 0], sizes = [8, 32], strides = [1, 1]} : vector<32x32xbf16> to vector<8x32xbf16>
    %cst_110 = arith.constant dense<0.000000e+00> : vector<8x32xf32>
    %299 = tpu.matmul %297, %298, %cst_110 {dimension_numbers = #tpu.dot_dimension_numbers<[1], [0], [0], [1], [0, 0, 1, 1], [], []>} : vector<8x8xbf16>, vector<8x32xbf16>, vector<8x32xf32> -> vector<8x32xf32>
    %300 = arith.addf %273, %299 : vector<8x32xf32>
    %301 = vector.extract_strided_slice %245 {offsets = [0, 16], sizes = [8, 8], strides = [1, 1]} : vector<8x96xf32> to vector<8x8xf32>
    %302 = vector.extract_strided_slice %245 {offsets = [0, 48], sizes = [8, 8], strides = [1, 1]} : vector<8x96xf32> to vector<8x8xf32>
    %303 = vector.extract_strided_slice %245 {offsets = [0, 80], sizes = [8, 8], strides = [1, 1]} : vector<8x96xf32> to vector<8x8xf32>
    %304 = arith.truncf %301 : vector<8x8xf32> to vector<8x8xbf16>
    %305 = arith.truncf %302 : vector<8x8xf32> to vector<8x8xbf16>
    %cst_111 = arith.constant dense<0.000000e+00> : vector<8x8xf32>
    %306 = tpu.matmul %304, %305, %cst_111 {dimension_numbers = #tpu.dot_dimension_numbers<[1], [1], [0], [0], [0, 0, 1, 0], [], []>} : vector<8x8xbf16>, vector<8x8xbf16>, vector<8x8xf32> -> vector<8x8xf32>
    %cst_112 = arith.constant 0.353553385 : f32
    %307 = vector.broadcast %cst_112 : f32 to vector<8x8xf32>
    %308 = arith.mulf %306, %307 : vector<8x8xf32>
    %309 = vector.broadcast %29 : vector<1x8xf32> to vector<8x8xf32>
    %310 = arith.addf %308, %309 : vector<8x8xf32>
    %cst_113 = arith.constant dense<0xFF800000> : vector<8xf32>
    %311 = vector.multi_reduction <maximumf>, %310, %cst_113 [1] : vector<8x8xf32> to vector<8xf32>
    %312 = vector.shape_cast %311 : vector<8xf32> to vector<8x1xf32>
    %313 = vector.broadcast %312 : vector<8x1xf32> to vector<8x8xf32>
    %314 = arith.subf %310, %313 : vector<8x8xf32>
    %315 = math.exp %314 : vector<8x8xf32>
    %cst_114 = arith.constant dense<0.000000e+00> : vector<8xf32>
    %316 = vector.multi_reduction <add>, %315, %cst_114 [1] : vector<8x8xf32> to vector<8xf32>
    %317 = vector.shape_cast %316 : vector<8xf32> to vector<8x1xf32>
    %318 = tpu.reciprocal %317 {approx = true} : vector<8x1xf32> -> vector<8x1xf32>
    %319 = vector.broadcast %318 : vector<8x1xf32> to vector<8x8xf32>
    %320 = arith.mulf %315, %319 : vector<8x8xf32>
    %321 = arith.truncf %320 : vector<8x8xf32> to vector<8x8xbf16>
    %322 = arith.truncf %303 : vector<8x8xf32> to vector<8x8xbf16>
    %cst_115 = arith.constant dense<0.000000e+00> : vector<8x8xf32>
    %323 = tpu.matmul %321, %322, %cst_115 {dimension_numbers = #tpu.dot_dimension_numbers<[1], [0], [0], [1], [0, 0, 1, 1], [], []>} : vector<8x8xbf16>, vector<8x8xbf16>, vector<8x8xf32> -> vector<8x8xf32>
    %324 = arith.truncf %323 : vector<8x8xf32> to vector<8x8xbf16>
    %325 = vector.extract_strided_slice %247 {offsets = [16, 0], sizes = [8, 32], strides = [1, 1]} : vector<32x32xbf16> to vector<8x32xbf16>
    %cst_116 = arith.constant dense<0.000000e+00> : vector<8x32xf32>
    %326 = tpu.matmul %324, %325, %cst_116 {dimension_numbers = #tpu.dot_dimension_numbers<[1], [0], [0], [1], [0, 0, 1, 1], [], []>} : vector<8x8xbf16>, vector<8x32xbf16>, vector<8x32xf32> -> vector<8x32xf32>
    %327 = arith.addf %300, %326 : vector<8x32xf32>
    %328 = vector.extract_strided_slice %245 {offsets = [0, 24], sizes = [8, 8], strides = [1, 1]} : vector<8x96xf32> to vector<8x8xf32>
    %329 = vector.extract_strided_slice %245 {offsets = [0, 56], sizes = [8, 8], strides = [1, 1]} : vector<8x96xf32> to vector<8x8xf32>
    %330 = vector.extract_strided_slice %245 {offsets = [0, 88], sizes = [8, 8], strides = [1, 1]} : vector<8x96xf32> to vector<8x8xf32>
    %331 = arith.truncf %328 : vector<8x8xf32> to vector<8x8xbf16>
    %332 = arith.truncf %329 : vector<8x8xf32> to vector<8x8xbf16>
    %cst_117 = arith.constant dense<0.000000e+00> : vector<8x8xf32>
    %333 = tpu.matmul %331, %332, %cst_117 {dimension_numbers = #tpu.dot_dimension_numbers<[1], [1], [0], [0], [0, 0, 1, 0], [], []>} : vector<8x8xbf16>, vector<8x8xbf16>, vector<8x8xf32> -> vector<8x8xf32>
    %cst_118 = arith.constant 0.353553385 : f32
    %334 = vector.broadcast %cst_118 : f32 to vector<8x8xf32>
    %335 = arith.mulf %333, %334 : vector<8x8xf32>
    %336 = vector.broadcast %29 : vector<1x8xf32> to vector<8x8xf32>
    %337 = arith.addf %335, %336 : vector<8x8xf32>
    %cst_119 = arith.constant dense<0xFF800000> : vector<8xf32>
    %338 = vector.multi_reduction <maximumf>, %337, %cst_119 [1] : vector<8x8xf32> to vector<8xf32>
    %339 = vector.shape_cast %338 : vector<8xf32> to vector<8x1xf32>
    %340 = vector.broadcast %339 : vector<8x1xf32> to vector<8x8xf32>
    %341 = arith.subf %337, %340 : vector<8x8xf32>
    %342 = math.exp %341 : vector<8x8xf32>
    %cst_120 = arith.constant dense<0.000000e+00> : vector<8xf32>
    %343 = vector.multi_reduction <add>, %342, %cst_120 [1] : vector<8x8xf32> to vector<8xf32>
    %344 = vector.shape_cast %343 : vector<8xf32> to vector<8x1xf32>
    %345 = tpu.reciprocal %344 {approx = true} : vector<8x1xf32> -> vector<8x1xf32>
    %346 = vector.broadcast %345 : vector<8x1xf32> to vector<8x8xf32>
    %347 = arith.mulf %342, %346 : vector<8x8xf32>
    %348 = arith.truncf %347 : vector<8x8xf32> to vector<8x8xbf16>
    %349 = arith.truncf %330 : vector<8x8xf32> to vector<8x8xbf16>
    %cst_121 = arith.constant dense<0.000000e+00> : vector<8x8xf32>
    %350 = tpu.matmul %348, %349, %cst_121 {dimension_numbers = #tpu.dot_dimension_numbers<[1], [0], [0], [1], [0, 0, 1, 1], [], []>} : vector<8x8xbf16>, vector<8x8xbf16>, vector<8x8xf32> -> vector<8x8xf32>
    %351 = arith.truncf %350 : vector<8x8xf32> to vector<8x8xbf16>
    %352 = vector.extract_strided_slice %247 {offsets = [24, 0], sizes = [8, 32], strides = [1, 1]} : vector<32x32xbf16> to vector<8x32xbf16>
    %cst_122 = arith.constant dense<0.000000e+00> : vector<8x32xf32>
    %353 = tpu.matmul %351, %352, %cst_122 {dimension_numbers = #tpu.dot_dimension_numbers<[1], [0], [0], [1], [0, 0, 1, 1], [], []>} : vector<8x8xbf16>, vector<8x32xbf16>, vector<8x32xf32> -> vector<8x32xf32>
    %354 = arith.addf %327, %353 : vector<8x32xf32>
    %c1_123 = arith.constant 1 : index
    %c0_124 = arith.constant 0 : index
    %c0_125 = arith.constant 0 : index
    %355 = vector.load %arg8[%c1_123, %c0_124, %c0_125] : memref<2x1x32xf32, #tpu.memory_space<vmem>>, vector<1x1x32xf32>
    %356 = vector.shape_cast %355 : vector<1x1x32xf32> to vector<1x32xf32>
    %357 = vector.broadcast %356 : vector<1x32xf32> to vector<8x32xf32>
    %358 = arith.addf %354, %357 : vector<8x32xf32>
    %359 = arith.addf %237, %358 : vector<8x32xf32>
    %c1_126 = arith.constant 1 : index
    %c0_127 = arith.constant 0 : index
    %c0_128 = arith.constant 0 : index
    %360 = vector.load %arg9[%c1_126, %c0_127, %c0_128] : memref<2x1x32xf32, #tpu.memory_space<vmem>>, vector<1x1x32xf32>
    %361 = vector.shape_cast %360 : vector<1x1x32xf32> to vector<1x32xf32>
    %c1_129 = arith.constant 1 : index
    %c0_130 = arith.constant 0 : index
    %c0_131 = arith.constant 0 : index
    %362 = vector.load %arg10[%c1_129, %c0_130, %c0_131] : memref<2x1x32xf32, #tpu.memory_space<vmem>>, vector<1x1x32xf32>
    %363 = vector.shape_cast %362 : vector<1x1x32xf32> to vector<1x32xf32>
    %cst_132 = arith.constant dense<0.000000e+00> : vector<8xf32>
    %364 = vector.multi_reduction <add>, %359, %cst_132 [1] : vector<8x32xf32> to vector<8xf32>
    %365 = vector.shape_cast %364 : vector<8xf32> to vector<8x1xf32>
    %cst_133 = arith.constant 3.200000e+01 : f32
    %366 = vector.broadcast %cst_133 : f32 to vector<8x1xf32>
    %367 = arith.divf %365, %366 : vector<8x1xf32>
    %368 = vector.broadcast %367 : vector<8x1xf32> to vector<8x32xf32>
    %369 = arith.subf %359, %368 : vector<8x32xf32>
    %370 = vector.broadcast %367 : vector<8x1xf32> to vector<8x32xf32>
    %371 = arith.subf %359, %370 : vector<8x32xf32>
    %372 = arith.mulf %369, %371 : vector<8x32xf32>
    %cst_134 = arith.constant dense<0.000000e+00> : vector<8xf32>
    %373 = vector.multi_reduction <add>, %372, %cst_134 [1] : vector<8x32xf32> to vector<8xf32>
    %374 = vector.shape_cast %373 : vector<8xf32> to vector<8x1xf32>
    %cst_135 = arith.constant 3.200000e+01 : f32
    %375 = vector.broadcast %cst_135 : f32 to vector<8x1xf32>
    %376 = arith.divf %374, %375 : vector<8x1xf32>
    %377 = vector.broadcast %367 : vector<8x1xf32> to vector<8x32xf32>
    %378 = arith.subf %359, %377 : vector<8x32xf32>
    %cst_136 = arith.constant 9.99999996E-13 : f32
    %379 = vector.broadcast %cst_136 : f32 to vector<8x1xf32>
    %380 = arith.addf %376, %379 : vector<8x1xf32>
    %381 = math.rsqrt %380 : vector<8x1xf32>
    %382 = vector.broadcast %381 : vector<8x1xf32> to vector<8x32xf32>
    %383 = arith.mulf %378, %382 : vector<8x32xf32>
    %384 = vector.broadcast %361 : vector<1x32xf32> to vector<8x32xf32>
    %385 = arith.mulf %383, %384 : vector<8x32xf32>
    %386 = vector.broadcast %363 : vector<1x32xf32> to vector<8x32xf32>
    %387 = arith.addf %385, %386 : vector<8x32xf32>
    %388 = arith.truncf %387 : vector<8x32xf32> to vector<8x32xbf16>
    %c1_137 = arith.constant 1 : index
    %c0_138 = arith.constant 0 : index
    %c0_139 = arith.constant 0 : index
    %389 = vector.load %arg11[%c1_137, %c0_138, %c0_139] : memref<2x32x64xbf16, #tpu.memory_space<vmem>>, vector<1x32x64xbf16>
    %390 = vector.shape_cast %389 : vector<1x32x64xbf16> to vector<32x64xbf16>
    %cst_140 = arith.constant dense<0.000000e+00> : vector<8x64xf32>
    %391 = tpu.matmul %388, %390, %cst_140 {dimension_numbers = #tpu.dot_dimension_numbers<[1], [0], [0], [1], [0, 0, 1, 1], [], []>} : vector<8x32xbf16>, vector<32x64xbf16>, vector<8x64xf32> -> vector<8x64xf32>
    %c1_141 = arith.constant 1 : index
    %c0_142 = arith.constant 0 : index
    %c0_143 = arith.constant 0 : index
    %392 = vector.load %arg12[%c1_141, %c0_142, %c0_143] : memref<2x1x64xf32, #tpu.memory_space<vmem>>, vector<1x1x64xf32>
    %393 = vector.shape_cast %392 : vector<1x1x64xf32> to vector<1x64xf32>
    %394 = vector.broadcast %393 : vector<1x64xf32> to vector<8x64xf32>
    %395 = arith.addf %391, %394 : vector<8x64xf32>
    %396 = arith.mulf %395, %395 : vector<8x64xf32>
    %397 = arith.mulf %395, %396 : vector<8x64xf32>
    %cst_144 = arith.constant 4.471500e-02 : f32
    %398 = vector.broadcast %cst_144 : f32 to vector<8x64xf32>
    %399 = arith.mulf %398, %397 : vector<8x64xf32>
    %400 = arith.addf %395, %399 : vector<8x64xf32>
    %cst_145 = arith.constant 0.797884583 : f32
    %401 = vector.broadcast %cst_145 : f32 to vector<8x64xf32>
    %402 = arith.mulf %401, %400 : vector<8x64xf32>
    %403 = math.tanh %402 : vector<8x64xf32>
    %cst_146 = arith.constant 1.000000e+00 : f32
    %404 = vector.broadcast %cst_146 : f32 to vector<8x64xf32>
    %405 = arith.addf %404, %403 : vector<8x64xf32>
    %cst_147 = arith.constant 5.000000e-01 : f32
    %406 = vector.broadcast %cst_147 : f32 to vector<8x64xf32>
    %407 = arith.mulf %406, %405 : vector<8x64xf32>
    %408 = arith.mulf %395, %407 : vector<8x64xf32>
    %409 = arith.truncf %408 : vector<8x64xf32> to vector<8x64xbf16>
    %c1_148 = arith.constant 1 : index
    %c0_149 = arith.constant 0 : index
    %c0_150 = arith.constant 0 : index
    %410 = vector.load %arg13[%c1_148, %c0_149, %c0_150] : memref<2x64x32xbf16, #tpu.memory_space<vmem>>, vector<1x64x32xbf16>
    %411 = vector.shape_cast %410 : vector<1x64x32xbf16> to vector<64x32xbf16>
    %cst_151 = arith.constant dense<0.000000e+00> : vector<8x32xf32>
    %412 = tpu.matmul %409, %411, %cst_151 {dimension_numbers = #tpu.dot_dimension_numbers<[1], [0], [0], [1], [0, 0, 1, 1], [], []>} : vector<8x64xbf16>, vector<64x32xbf16>, vector<8x32xf32> -> vector<8x32xf32>
    %c1_152 = arith.constant 1 : index
    %c0_153 = arith.constant 0 : index
    %c0_154 = arith.constant 0 : index
    %413 = vector.load %arg14[%c1_152, %c0_153, %c0_154] : memref<2x1x32xf32, #tpu.memory_space<vmem>>, vector<1x1x32xf32>
    %414 = vector.shape_cast %413 : vector<1x1x32xf32> to vector<1x32xf32>
    %415 = vector.broadcast %414 : vector<1x32xf32> to vector<8x32xf32>
    %416 = arith.addf %412, %415 : vector<8x32xf32>
    %417 = arith.addf %387, %416 : vector<8x32xf32>
    %c1_155 = arith.constant 1 : index
    %c0_156 = arith.constant 0 : index
    %c0_157 = arith.constant 0 : index
    %418 = vector.load %arg15[%c1_155, %c0_156, %c0_157] : memref<2x1x32xf32, #tpu.memory_space<vmem>>, vector<1x1x32xf32>
    %419 = vector.shape_cast %418 : vector<1x1x32xf32> to vector<1x32xf32>
    %c1_158 = arith.constant 1 : index
    %c0_159 = arith.constant 0 : index
    %c0_160 = arith.constant 0 : index
    %420 = vector.load %arg16[%c1_158, %c0_159, %c0_160] : memref<2x1x32xf32, #tpu.memory_space<vmem>>, vector<1x1x32xf32>
    %421 = vector.shape_cast %420 : vector<1x1x32xf32> to vector<1x32xf32>
    %cst_161 = arith.constant dense<0.000000e+00> : vector<8xf32>
    %422 = vector.multi_reduction <add>, %417, %cst_161 [1] : vector<8x32xf32> to vector<8xf32>
    %423 = vector.shape_cast %422 : vector<8xf32> to vector<8x1xf32>
    %cst_162 = arith.constant 3.200000e+01 : f32
    %424 = vector.broadcast %cst_162 : f32 to vector<8x1xf32>
    %425 = arith.divf %423, %424 : vector<8x1xf32>
    %426 = vector.broadcast %425 : vector<8x1xf32> to vector<8x32xf32>
    %427 = arith.subf %417, %426 : vector<8x32xf32>
    %428 = vector.broadcast %425 : vector<8x1xf32> to vector<8x32xf32>
    %429 = arith.subf %417, %428 : vector<8x32xf32>
    %430 = arith.mulf %427, %429 : vector<8x32xf32>
    %cst_163 = arith.constant dense<0.000000e+00> : vector<8xf32>
    %431 = vector.multi_reduction <add>, %430, %cst_163 [1] : vector<8x32xf32> to vector<8xf32>
    %432 = vector.shape_cast %431 : vector<8xf32> to vector<8x1xf32>
    %cst_164 = arith.constant 3.200000e+01 : f32
    %433 = vector.broadcast %cst_164 : f32 to vector<8x1xf32>
    %434 = arith.divf %432, %433 : vector<8x1xf32>
    %435 = vector.broadcast %425 : vector<8x1xf32> to vector<8x32xf32>
    %436 = arith.subf %417, %435 : vector<8x32xf32>
    %cst_165 = arith.constant 9.99999996E-13 : f32
    %437 = vector.broadcast %cst_165 : f32 to vector<8x1xf32>
    %438 = arith.addf %434, %437 : vector<8x1xf32>
    %439 = math.rsqrt %438 : vector<8x1xf32>
    %440 = vector.broadcast %439 : vector<8x1xf32> to vector<8x32xf32>
    %441 = arith.mulf %436, %440 : vector<8x32xf32>
    %442 = vector.broadcast %419 : vector<1x32xf32> to vector<8x32xf32>
    %443 = arith.mulf %441, %442 : vector<8x32xf32>
    %444 = vector.broadcast %421 : vector<1x32xf32> to vector<8x32xf32>
    %445 = arith.addf %443, %444 : vector<8x32xf32>
    %cst_166 = arith.constant dense<0.000000e+00> : vector<32xf32>
    %446 = vector.multi_reduction <add>, %445, %cst_166 [0] : vector<8x32xf32> to vector<32xf32>
    %447 = vector.shape_cast %446 : vector<32xf32> to vector<1x32xf32>
    %cst_167 = arith.constant 8.000000e+00 : f32
    %448 = vector.broadcast %cst_167 : f32 to vector<1x32xf32>
    %449 = arith.divf %447, %448 : vector<1x32xf32>
    %450 = arith.truncf %449 : vector<1x32xf32> to vector<1x32xbf16>
    %c0_168 = arith.constant 0 : index
    %c0_169 = arith.constant 0 : index
    %451 = vector.load %arg17[%c0_168, %c0_169] : memref<32x256xbf16, #tpu.memory_space<vmem>>, vector<32x256xbf16>
    %cst_170 = arith.constant dense<0.000000e+00> : vector<1x256xf32>
    %452 = tpu.matmul %450, %451, %cst_170 {dimension_numbers = #tpu.dot_dimension_numbers<[1], [0], [0], [1], [0, 0, 1, 1], [], []>} : vector<1x32xbf16>, vector<32x256xbf16>, vector<1x256xf32> -> vector<1x256xf32>
    %c0_171 = arith.constant 0 : index
    %c0_172 = arith.constant 0 : index
    %453 = vector.load %arg18[%c0_171, %c0_172] : memref<1x256xf32, #tpu.memory_space<vmem>>, vector<1x256xf32>
    %454 = arith.addf %452, %453 : vector<1x256xf32>
    %cst_173 = arith.constant 0.000000e+00 : f32
    %455 = vector.broadcast %cst_173 : f32 to vector<1x256xf32>
    %456 = arith.cmpf ogt, %454, %455 : vector<1x256xf32>
    %cst_174 = arith.constant 0.00999999977 : f32
    %457 = vector.broadcast %cst_174 : f32 to vector<1x256xf32>
    %458 = arith.mulf %457, %454 : vector<1x256xf32>
    %459 = arith.select %456, %454, %458 : vector<1x256xi1>, vector<1x256xf32>
    %460 = arith.truncf %459 : vector<1x256xf32> to vector<1x256xbf16>
    %c0_175 = arith.constant 0 : index
    %c0_176 = arith.constant 0 : index
    %461 = vector.load %arg19[%c0_175, %c0_176] : memref<256x128xbf16, #tpu.memory_space<vmem>>, vector<256x128xbf16>
    %cst_177 = arith.constant dense<0.000000e+00> : vector<1x128xf32>
    %462 = tpu.matmul %460, %461, %cst_177 {dimension_numbers = #tpu.dot_dimension_numbers<[1], [0], [0], [1], [0, 0, 1, 1], [], []>} : vector<1x256xbf16>, vector<256x128xbf16>, vector<1x128xf32> -> vector<1x128xf32>
    %c0_178 = arith.constant 0 : index
    %c0_179 = arith.constant 0 : index
    %463 = vector.load %arg20[%c0_178, %c0_179] : memref<1x128xf32, #tpu.memory_space<vmem>>, vector<1x128xf32>
    %464 = arith.addf %462, %463 : vector<1x128xf32>
    %c0_180 = arith.constant 0 : index
    %c0_181 = arith.constant 0 : index
    %c0_182 = arith.constant 0 : index
    %465 = vector.load %arg21[%c0_180, %c0_181, %c0_182] : memref<1x1x128xf32, #tpu.memory_space<vmem>>, vector<1x1x128xf32>
    %466 = vector.shape_cast %465 : vector<1x1x128xf32> to vector<1x128xf32>
    %467 = vector.shape_cast %464 : vector<1x128xf32> to vector<1x1x128xf32>
    tpu.vector_store %arg21[%c0_180, %c0_181, %c0_182], %467 {strides = array<i32>} : memref<1x1x128xf32, #tpu.memory_space<vmem>>, vector<1x1x128xf32>,
    return
  }
  func.func @transform_0(%arg0: i32) -> (i32, i32, i32) {
    %c0_i32 = arith.constant 0 : i32
    %c0_i32_0 = arith.constant 0 : i32
    %c0_i32_1 = arith.constant 0 : i32
    return %arg0, %c0_i32, %c0_i32_0 : i32, i32, i32
  }
  func.func @transform_1(%arg0: i32) -> (i32, i32, i32) {
    %c0_i32 = arith.constant 0 : i32
    %c0_i32_0 = arith.constant 0 : i32
    %c0_i32_1 = arith.constant 0 : i32
    return %arg0, %c0_i32, %c0_i32_0 : i32, i32, i32
  }
  func.func @transform_2(%arg0: i32) -> (i32, i32) {
    %c0_i32 = arith.constant 0 : i32
    %c0_i32_0 = arith.constant 0 : i32
    %c0_i32_1 = arith.constant 0 : i32
    return %c0_i32, %c0_i32_0 : i32, i32
  }
  func.func @transform_3(%arg0: i32) -> (i32, i32) {
    %c0_i32 = arith.constant 0 : i32
    %c0_i32_0 = arith.constant 0 : i32
    %c0_i32_1 = arith.constant 0 : i32
    return %c0_i32, %c0_i32_0 : i32, i32
  }
  func.func @transform_4(%arg0: i32) -> (i32, i32, i32) {
    %c0_i32 = arith.constant 0 : i32
    %c0_i32_0 = arith.constant 0 : i32
    %c0_i32_1 = arith.constant 0 : i32
    %c0_i32_2 = arith.constant 0 : i32
    return %c0_i32, %c0_i32_0, %c0_i32_1 : i32, i32, i32
  }
  func.func @transform_5(%arg0: i32) -> (i32, i32, i32) {
    %c0_i32 = arith.constant 0 : i32
    %c0_i32_0 = arith.constant 0 : i32
    %c0_i32_1 = arith.constant 0 : i32
    %c0_i32_2 = arith.constant 0 : i32
    return %c0_i32, %c0_i32_0, %c0_i32_1 : i32, i32, i32
  }
  func.func @transform_6(%arg0: i32) -> (i32, i32, i32) {
    %c0_i32 = arith.constant 0 : i32
    %c0_i32_0 = arith.constant 0 : i32
    %c0_i32_1 = arith.constant 0 : i32
    %c0_i32_2 = arith.constant 0 : i32
    return %c0_i32, %c0_i32_0, %c0_i32_1 : i32, i32, i32
  }
  func.func @transform_7(%arg0: i32) -> (i32, i32, i32) {
    %c0_i32 = arith.constant 0 : i32
    %c0_i32_0 = arith.constant 0 : i32
    %c0_i32_1 = arith.constant 0 : i32
    %c0_i32_2 = arith.constant 0 : i32
    return %c0_i32, %c0_i32_0, %c0_i32_1 : i32, i32, i32
  }
  func.func @transform_8(%arg0: i32) -> (i32, i32, i32) {
    %c0_i32 = arith.constant 0 : i32
    %c0_i32_0 = arith.constant 0 : i32
    %c0_i32_1 = arith.constant 0 : i32
    %c0_i32_2 = arith.constant 0 : i32
    return %c0_i32, %c0_i32_0, %c0_i32_1 : i32, i32, i32
  }
  func.func @transform_9(%arg0: i32) -> (i32, i32, i32) {
    %c0_i32 = arith.constant 0 : i32
    %c0_i32_0 = arith.constant 0 : i32
    %c0_i32_1 = arith.constant 0 : i32
    %c0_i32_2 = arith.constant 0 : i32
    return %c0_i32, %c0_i32_0, %c0_i32_1 : i32, i32, i32
  }
  func.func @transform_10(%arg0: i32) -> (i32, i32, i32) {
    %c0_i32 = arith.constant 0 : i32
    %c0_i32_0 = arith.constant 0 : i32
    %c0_i32_1 = arith.constant 0 : i32
    %c0_i32_2 = arith.constant 0 : i32
    return %c0_i32, %c0_i32_0, %c0_i32_1 : i32, i32, i32
  }
  func.func @transform_11(%arg0: i32) -> (i32, i32, i32) {
    %c0_i32 = arith.constant 0 : i32
    %c0_i32_0 = arith.constant 0 : i32
    %c0_i32_1 = arith.constant 0 : i32
    %c0_i32_2 = arith.constant 0 : i32
    return %c0_i32, %c0_i32_0, %c0_i32_1 : i32, i32, i32
  }
  func.func @transform_12(%arg0: i32) -> (i32, i32, i32) {
    %c0_i32 = arith.constant 0 : i32
    %c0_i32_0 = arith.constant 0 : i32
    %c0_i32_1 = arith.constant 0 : i32
    %c0_i32_2 = arith.constant 0 : i32
    return %c0_i32, %c0_i32_0, %c0_i32_1 : i32, i32, i32
  }
  func.func @transform_13(%arg0: i32) -> (i32, i32, i32) {
    %c0_i32 = arith.constant 0 : i32
    %c0_i32_0 = arith.constant 0 : i32
    %c0_i32_1 = arith.constant 0 : i32
    %c0_i32_2 = arith.constant 0 : i32
    return %c0_i32, %c0_i32_0, %c0_i32_1 : i32, i32, i32
  }
  func.func @transform_14(%arg0: i32) -> (i32, i32, i32) {
    %c0_i32 = arith.constant 0 : i32
    %c0_i32_0 = arith.constant 0 : i32
    %c0_i32_1 = arith.constant 0 : i32
    %c0_i32_2 = arith.constant 0 : i32
    return %c0_i32, %c0_i32_0, %c0_i32_1 : i32, i32, i32
  }
  func.func @transform_15(%arg0: i32) -> (i32, i32, i32) {
    %c0_i32 = arith.constant 0 : i32
    %c0_i32_0 = arith.constant 0 : i32
    %c0_i32_1 = arith.constant 0 : i32
    %c0_i32_2 = arith.constant 0 : i32
    return %c0_i32, %c0_i32_0, %c0_i32_1 : i32, i32, i32
  }
  func.func @transform_16(%arg0: i32) -> (i32, i32) {
    %c0_i32 = arith.constant 0 : i32
    %c0_i32_0 = arith.constant 0 : i32
    %c0_i32_1 = arith.constant 0 : i32
    return %c0_i32, %c0_i32_0 : i32, i32
  }
  func.func @transform_17(%arg0: i32) -> (i32, i32) {
    %c0_i32 = arith.constant 0 : i32
    %c0_i32_0 = arith.constant 0 : i32
    %c0_i32_1 = arith.constant 0 : i32
    return %c0_i32, %c0_i32_0 : i32, i32
  }
  func.func @transform_18(%arg0: i32) -> (i32, i32) {
    %c0_i32 = arith.constant 0 : i32
    %c0_i32_0 = arith.constant 0 : i32
    %c0_i32_1 = arith.constant 0 : i32
    return %c0_i32, %c0_i32_0 : i32, i32
  }
  func.func @transform_19(%arg0: i32) -> (i32, i32) {
    %c0_i32 = arith.constant 0 : i32
    %c0_i32_0 = arith.constant 0 : i32
    %c0_i32_1 = arith.constant 0 : i32
    return %c0_i32, %c0_i32_0 : i32, i32
  }
  func.func @transform_20(%arg0: i32) -> (i32, i32, i32) {
    %c0_i32 = arith.constant 0 : i32
    %c0_i32_0 = arith.constant 0 : i32
    %c0_i32_1 = arith.constant 0 : i32
    return %arg0, %c0_i32, %c0_i32_0 : i32, i32, i32
  }
}

</mosaic_0001>

<bundles_post_ra>
// kernel: forward.1
= control target key start
LH: loop header
LB: loop body
LE: loop exit
PB: predicated region body
PF: predicated region fallthrough
CT: control target
= control target key end

     0   :  { %s4110_s0 = inlined_call_operand.vmem [shape: f32[2,8,32], index: 0, kind: input, shape index: {}]   ;;  %s4111_s1 = inlined_call_operand.vmem [shape: f32[2,1,8], index: 1, kind: input, shape index: {}]   ;;  %s4112_s2 = inlined_call_operand.vmem [shape: f32[1,32], index: 2, kind: input, shape index: {}]   ;;  %s4113_s3 = inlined_call_operand.vmem [shape: f32[1,32], index: 3, kind: input, shape index: {}]   ;;  %s4114_s4 = inlined_call_operand.hbm [shape: bf16[2,32,96], index: 4, kind: input, shape index: {}]   ;;  %s4115_s5 = inlined_call_operand.vmem [shape: f32[2,1,96], index: 5, kind: input, shape index: {}]   ;;  %s4116_s6 = inlined_call_operand.vmem [shape: bf16[2,32,32], index: 6, kind: input, shape index: {}]   ;;  %s4117_s7 = inlined_call_operand.vmem [shape: f32[2,1,32], index: 7, kind: input, shape index: {}, may-alias: {7,9,13,15}]   ;;  %s4118_s8 = inlined_call_operand.vmem [shape: f32[2,1,32], index: 8, kind: input, shape index: {}, may-alias: {8,14}]   ;;  %s4119_s9 = inlined_call_operand.vmem [shape: f32[2,1,32], index: 9, kind: input, shape index: {}, may-alias: {7,9,13,15}]   ;;  %s4120_s10 = inlined_call_operand.vmem [shape: bf16[2,32,64], index: 10, kind: input, shape index: {}]   ;;  %s4121_s11 = inlined_call_operand.vmem [shape: f32[2,1,64], index: 11, kind: input, shape index: {}]   ;;  %s4122_s12 = inlined_call_operand.vmem [shape: bf16[2,64,32], index: 12, kind: input, shape index: {}]   ;;  %s4123_s13 = inlined_call_operand.vmem [shape: f32[2,1,32], index: 13, kind: input, shape index: {}, may-alias: {7,9,13,15}]   ;;  %s4124_s14 = inlined_call_operand.vmem [shape: f32[2,1,32], index: 14, kind: input, shape index: {}, may-alias: {8,14}]   ;;  %s4125_s15 = inlined_call_operand.vmem [shape: f32[2,1,32], index: 15, kind: input, shape index: {}, may-alias: {7,9,13,15}]   ;;  %s4126_s16 = inlined_call_operand.vmem [shape: bf16[32,256], index: 16, kind: input, shape index: {}]   ;;  %s4127_s17 = inlined_call_operand.vmem [shape: f32[1,256], index: 17, kind: input, shape index: {}]   ;;  %s4128_s18 = inlined_call_operand.vmem [shape: bf16[256,128], index: 18, kind: input, shape index: {}]   ;;  %s4129_s19 = inlined_call_operand.vmem [shape: f32[1,128], index: 19, kind: input, shape index: {}]   ;;  %s4130_s20 = inlined_call_operand.vmem [shape: f32[2,1,128], index: 20, kind: output, shape index: {}]  }
   0x1   :  { %4140 = sst [smem:[#allocation5_spill]] %s4110_s0 }
   0x2   :  { %4141 = sst [smem:[#allocation6_spill]] %s4111_s1 }
   0x3   :  { %4142 = sst [smem:[#allocation7_spill]] %s4112_s2 }
   0x4   :  { %4143 = sst [smem:[#allocation8_spill]] %s4113_s3 }
   0x5   :  { %4144 = sst [smem:[#allocation9_spill]] %s4114_s4 }
   0x6   :  { %25 = vsyncpa [#allocation3], 0  ;;  %s3608_s1 = smov 0  }
   0x7 LB: > { %s3614_s22 = sadd.s32 4294967295, %s3484_s1   ;;  %p2917_p0 = scmp.ge.s32.totalorder %s3484_s1, 1  ;;  %s3484_s1 = sphi %s3608_s1, %s31_s1  }
   0x8   : > { %p492_p1 = scmp.lt.s32.totalorder %s3484_s1, 3  ;;  %s3486_s23 = smov [#allocation2]  }
   0x9   : > { %s510_s24 = sshll.u32 %s3486_s23, 4  ;;  %p4132_p3 = scmp.eq.s32.totalorder %s3614_s22, 0  ;;  %s511_s24 = int_to_ptr.vmem [resolvable:$true] %s510_s24 }
   0xa   : > { %p3618_p2 = pnand %p2917_p0, %p492_p1  ;;  %s4147_s27 = sld [smem:[#allocation9_spill]] }
   0xc   : > { %s4145_s2 = scalar_select %p3618_p2, 1, 0 }
   0xd   : > { %p3331_p4 = pneg %p3618_p2 }
   0xf   : > { %p3627_p5 = pnand %p4132_p3, %p3331_p4 }
  0x10   : > { %s3446_s28 = scalar_lea.hbm %s4147_s27, 512 }
  0x11   : > { %p3447_p6 = scmp.ne.s32.totalorder %s4147_s27, %s3446_s28  ;;  %p3448_p7 = pneg %p3627_p5 }
  0x12   : > { %p3453_p10 = scmp.lt.u32.totalorder %s3446_s28, %s4147_s27 }
  0x13   : > { %p3449_p8 = pnand %p3448_p7, %p3447_p6 }
  0x15   : > { %p3450_p9 = pneg %p3449_p8 }
  0x17   : > { %p3455_p11 = pnand %p3453_p10, %p3450_p9 }
  0x19   : > { %3458 = shalt.err (!%p3455_p11)
}
  0x1a   : > { %s3459_s21 = scalar_lea.vmem %s511_s24, 512  ;;  %p3467_p1 = scmp.lt.s32.totalorder %s511_s24, %s511_s24 }
  0x1b   : > { %p3460_p12 = scmp.ne.s32.totalorder %s511_s24, %s3459_s21  ;;  %p3468_p4 = scmp.lt.s32.totalorder %s3459_s21, %s3459_s21 }
  0x1d   : > { %p3462_p13 = pnand %p3460_p12, %p3448_p7  ;;  %p3469_p3 = por %p3468_p4, %p3467_p1 }
  0x1f   : > { %p3463_p0 = pneg %p3462_p13 }
  0x21   : > { %p3470_p2 = pnand %p3469_p3, %p3463_p0 }
  0x23   : > { %3473 = shalt.err (!%p3470_p2)
}
  0x24   : > { %s3487_s23 = smov 64   ;;  %s3488_s3 = smov 4  }
  0x25   : > { %3334 = dma.hbm_to_vmem [thread:$0]  (!%p3627_p5), %s4147_s27, 512, %s511_s24, [#allocation3], %s3487_s23, %s3487_s23, %s3488_s3  }
  0x26   : > { %p4148_p6 = scmp.ne.s32.totalorder %s4145_s2, 0 }
  0x27   : > { %p4149_p8 = scmp.eq.s32.totalorder (!%p4148_p6), %s3614_s22, 0 }
  0x28   : > { %584 = sbr.rel (%p4148_p6) target bundleno = 8214 (0x2016), region = 100 }
  0x2f   : > { %3479 = dma.done.wait (%p4149_p8), [#allocation3], 512   ;;  %p4150_p7 = pmov %p4149_p8 }
  0x30   : > { %p642_p2 = scmp.lt.s32.totalorder %s3614_s22, 1  ;;  %s4151_s30 = sld [smem:[#allocation5_spill]]  ;;  %vm656_vm0 = vcmask 261120   ;;  %v3362_v7 = vld [vmem:[#allocation2] sm:$0xff]   ;;  %v3489_v8 = vmov 0.0   ;;  %v3363_v9 = vld [vmem:[#allocation2 + $0x8] sm:$0xff]  }
  0x31   : > { %3481 = vsyncadd (%p4150_p7), [#allocation3], 4294966784  ;;  %3127 = vmatprep.subr.bf16.mxu0 %v3489_v8  ;;  %3147 = vmatprep.subr.bf16.mxu1 %v3489_v8  ;;  %vm3490_vm1 = vmmov 0   ;;  %s4152_s21 = sld [smem:[#allocation7_spill]]  ;;  %s4153_s26 = sld [smem:[#allocation8_spill]]  ;;  %vm761_vm2 = vcmask 64512  }
  0x32   : > { %s4162_s22 = smov (!%p642_p2, %s3614_s22), 1  ;;  %3128 = vmatpush3.bf16.msra.mxu0 %v3362_v7  ;;  %3131 = vmatprep.mubr.msk.bf16.mxu0 %vm3490_vm1, %v3489_v8  ;;  %v2925_v20 = vld [vmem:[%s4115_s5] ss:$0 sm:$0xff]  ;;  %s3491_s28 = smov 120   ;;  %vm833_vm3 = vcmask 1043456   ;;  %vm1557_vm4 = vcmask 523264  }
  0x33   : > { %s2922_s25 = sshll.u32 %s4162_s22, 3  ;;  %3129 = vmatprep.subr.bf16.mxu0 %v3489_v8  ;;  %3149 = vmatprep.mubr.msk.bf16.mxu1 %vm3490_vm1, %v3489_v8  ;;  %s3492_s29 = smov 96   ;;  %v754_v7 = vld [vmem:[%s4116_s6 + $0x4] sm:$0xf] }
  0x34   : > { %s4154_s0 = sld [smem:[#allocation6_spill]]  ;;  %s3494_s23 = smov 56  }
  0x35   : > { %s4139_s3 = smov 64   ;;  %s4138_s4 = smov 112  }
  0x36   : > { %s645_s24 = scalar_lea.vmem %s4151_s30, %s2922_s25  ;;  %3130 = vmatpush3.bf16.msra.mxu0 %v3363_v9  ;;  %s3493_s30 = smov 88   ;;  %v995_v9 = vsel %vm833_vm3, %v754_v7, 0 }
  0x37   : > { %v653_v0 = vld [vmem:[%s645_s24] sm:$0xff]  ;;  %3135 = vmatprep.subr.bf16.mxu0 %v3489_v8  ;;  %s4136_s25 = smov 104   ;;  %s4137_s24 = smov 72  }
  0x38   : > { %v657_v1 = vsel %vm656_vm0, %v653_v0, 0.0  ;;  %v2923_v14 = vld [vmem:[%s4152_s21] ss:$0 sm:$0xff]  ;;  %s4134_s2 = smov 40  }
  0x39   : > { %658 = vadd.xlane.f32.xlu0 %v657_v1  ;;  %v2924_v16 = vld [vmem:[%s4153_s26] ss:$0 sm:$0xff]  ;;  %s3496_s26 = smov 80  }
  0x3a   : > { %s648_s21 = scalar_lea.vmem %s4154_s0, %s4162_s22 }
  0x3b   : > { %v3710_v32 = vld [vmem:[%s648_s21] ss:$0 sm:$0xff]  ;;  %s4135_s21 = smov 48  }
  0xc6   : > { %v659_v2 = vpop.xlane.xlu0 %658 }
  0xc7   : > { %v661_v3 = vmul.f32 0.03125, %v659_v2 }
  0xc9   : > { %v662_v4 = vsub.f32 %v653_v0, %v661_v3 }
  0xcb   : > { %v663_v5 = vmul.f32 %v662_v4, %v662_v4 }
  0xcd   : > { %v664_v6 = vsel %vm656_vm0, %v663_v5, 0.0  ;;  %v753_v5 = vld [vmem:[%s4116_s6] sm:$0xf] }
  0xce   : > { %665 = vadd.xlane.f32.xlu0 %v664_v6  ;;  %v1041_v6 = vsel %vm833_vm3, %v753_v5, 0 }
 0x15b   : > { %v666_v10 = vpop.xlane.xlu0 %665 }
 0x15c   : > { %v667_v11 = vmul.f32 0.03125, %v666_v10 }
 0x15e   : > { %v668_v12 = vadd.f32 1e-12, %v667_v11 }
 0x160   : > { %3400 = vrsqrt.f32 %v668_v12 }
 0x16a   : > { %v3401_v13 = vpop.eup %3400 }
 0x16b   : > { %v670_v15 = vmul.f32 %v3401_v13, %v662_v4 }
 0x16d   : > { %v677_v17 = vmul.f32 %v2923_v14, %v670_v15 }
 0x16f   : > { %v3677_v18 = vadd.f32 %v2924_v16, %v677_v17 }
 0x171   : > { %v686_v19 = vpack.c.bf16 %v3677_v18, %v3677_v18 }
 0x173   : > { %3132 = vmatmul.mubr.msk.bf16.vlgmr.msra.gmra.mrb[0].mxu0 %vm656_vm0, %v686_v19 }
 0x174   : > { %3137 = vmatprep.mubr.msk.bf16.mxu0 %vm3490_vm1, %v3489_v8 }
 0x246   : > { %v747_v21 = vpop.f32.mrb[0].mxu0 }
 0x247   : > { %v748_v22 = vadd.f32 %v2925_v20, %v747_v21  ;;  %v3133_v23 = vpop.f32.mrb[1].mxu0 }
 0x248   : > { %v750_v24 = vpop.f32.mrb[2].mxu0 }
 0x249   : > { %v3687_v25 = vpack.c.bf16 %v748_v22, %v748_v22  ;;  %v3134_v26 = vpop.f32.mrb[3].mxu0 }
 0x24b   : > { %878 = vrot.lane.b32.xlu0 %v3687_v25, %s3491_s28  ;;  %759 = vrot.lane.b32.xlu1 %v3687_v25, %s3492_s29 }
 0x24f   : > { %880 = vrot.lane.b32.xlu1 %v3687_v25, %s3493_s30 }
 0x2bd   : > { %v760_v27 = vpop.permute.xlu1 %759  ;;  %v879_v31 = vpop.permute.xlu0 %878 }
 0x2be   : > { %v766_v28 = vsel %vm761_vm2, %v760_v27, 0 }
 0x2bf   : > { %3136 = vmatpush3.bf16.xpose.msra.mxu0 %v766_v28 }
 0x2c0   : > { %3141 = vmatprep.subr.bf16.mxu0 %v3489_v8 }
 0x2c1   : > { %v881_v29 = vpop.permute.xlu1 %880 }
 0x2c2   : > { %v886_v30 = vsel %vm761_vm2, %v881_v29, 0 }
 0x2c3   : > { %3148 = vmatpush3.bf16.xpose.msra.mxu1 %v886_v30 }
 0x2c4   : > { %3159 = vmatprep.subr.bf16.mxu1 %v3489_v8 }
 0x2c6   : > { %3138 = vmatmul.mubr.msk.bf16.vlgmr.msra.gmra.mrb[4].mxu0 %vm761_vm2, %v3687_v25 }
 0x2c7   : > { %3143 = vmatprep.mubr.msk.bf16.mxu0 %vm3490_vm1, %v3489_v8 }
 0x2ca   : > { %3150 = vmatmul.mubr.msk.bf16.vlgmr.msra.gmra.mrb[0].mxu1 %vm761_vm2, %v879_v31 }
 0x2cb   : > { %3161 = vmatprep.mubr.msk.bf16.mxu1 %vm3490_vm1, %v3489_v8  ;;  %3160 = vmatpush3.bf16.msra.mxu1 %v995_v9 }
 0x2cc   : > { %3171 = vmatprep.subr.bf16.mxu1 %v3489_v8 }
 0x399   : > { %v802_v33 = vpop.f32.mrb[4].mxu0 }
 0x39a   : > { %v808_v34 = vmul.f32 0.35355338, %v802_v33  ;;  %v3139_v35 = vpop.f32.mrb[5].mxu0 }
 0x39b   : > { %v805_v36 = vpop.f32.mrb[6].mxu0 }
 0x39c   : > { %v3140_v37 = vpop.f32.mrb[7].mxu0  ;;  %v815_v38 = vadd.f32 %v3710_v32, %v808_v34 }
 0x39d   : > { %v922_v39 = vpop.f32.mrb[0].mxu1 }
 0x39e   : > { %v928_v40 = vmul.f32 0.35355338, %v922_v39  ;;  %v3151_v41 = vpop.f32.mrb[1].mxu1  ;;  %v816_v42 = vsel %vm761_vm2, %v815_v38, -inf }
 0x39f   : > { %v925_v43 = vpop.f32.mrb[2].mxu1  ;;  %817 = vmax.xlane.f32.xlu1 %v816_v42 }
 0x3a0   : > { %v3152_v44 = vpop.f32.mrb[3].mxu1  ;;  %v929_v45 = vadd.f32 %v3710_v32, %v928_v40 }
 0x3a2   : > { %v930_v46 = vsel %vm761_vm2, %v929_v45, -inf }
 0x3a3   : > { %931 = vmax.xlane.f32.xlu0 %v930_v46 }
 0x3b9   : > { %942 = vrot.lane.b32.xlu0 %v3687_v25, %s3494_s23 }
 0x42c   : > { %v818_v47 = vpop.xlane.xlu1 %817 }
 0x42d   : > { %v819_v48 = vsub.f32 %v815_v38, %v818_v47 }
 0x42f   : > { %v820_v49 = vmul.f32 1.442695, %v819_v48 }
 0x430   : > { %v932_v50 = vpop.xlane.xlu0 %931 }
 0x431   : > { %3402 = vpow2.f32 %v820_v49  ;;  %v933_v51 = vsub.f32 %v929_v45, %v932_v50 }
 0x433   : > { %v934_v52 = vmul.f32 1.442695, %v933_v51 }
 0x434   : > { %v943_v63 = vpop.permute.xlu0 %942 }
 0x435   : > { %3404 = vpow2.f32 %v934_v52  ;;  %v948_v2 = vsel %vm833_vm3, %v943_v63, 0 }
 0x43b   : > { %v3403_v53 = vpop.eup %3402 }
 0x43c   : > { %v822_v54 = vsel %vm761_vm2, %v3403_v53, 0.0 }
 0x43d   : > { %823 = vadd.xlane.f32.xlu1 %v822_v54 }
 0x43f   : > { %v3405_v55 = vpop.eup %3404 }
 0x440   : > { %v936_v56 = vsel %vm761_vm2, %v3405_v55, 0.0 }
 0x441   : > { %937 = vadd.xlane.f32.xlu1 %v936_v56  ;;  %v755_v56 = vld [vmem:[%s4116_s6 + $0x8] sm:$0xf] }
 0x452   : > { %828 = vrot.lane.b32.xlu1 %v3687_v25, %s4139_s3  ;;  %s4160_s3 = smov 40  }
 0x456   : > { %1085 = vrot.lane.b32.xlu1 %v3687_v25, %s3496_s26 }
 0x45a   : > { %1083 = vrot.lane.b32.xlu1 %v3687_v25, %s4138_s4 }
 0x4ca   : > { %v824_v57 = vpop.xlane.xlu1 %823 }
 0x4cb   : > { %3406 = vrcp.f32 %v824_v57  ;;  %v1200_v57 = vsel %vm833_vm3, %v755_v56, 0 }
 0x4ce   : > { %v938_v58 = vpop.xlane.xlu1 %937 }
 0x4cf   : > { %3408 = vrcp.f32 %v938_v58 }
 0x4d2   : > { %v829_v59 = vpop.permute.xlu1 %828 }
 0x4d3   : > { %v835_v60 = vsel %vm833_vm3, %v829_v59, 0 }
 0x4d4   : > { %3142 = vmatpush3.bf16.msra.mxu0 %v835_v60 }
 0x4d5   : > { %v3407_v61 = vpop.eup %3406  ;;  %3153 = vmatprep.subr.bf16.mxu0 %v3489_v8 }
 0x4d6   : > { %v826_v62 = vmul.f32 %v3407_v61, %v3403_v53  ;;  %v1086_v15 = vpop.permute.xlu1 %1085 }
 0x4d7   : > { %v1091_v21 = vsel %vm761_vm2, %v1086_v15, 0 }
 0x4d8   : > { %v827_v0 = vpack.c.bf16 %v826_v62, %v826_v62 }
 0x4d9   : > { %v3409_v1 = vpop.eup %3408 }
 0x4da   : > { %3144 = vmatmul.mubr.msk.bf16.vlgmr.msra.gmra.mrb[8].mxu0 %vm761_vm2, %v827_v0  ;;  %v940_v3 = vmul.f32 %v3409_v1, %v3405_v55  ;;  %v1084_v23 = vpop.permute.xlu1 %1083 }
 0x4db   : > { %3154 = vmatpush3.bf16.msra.mxu0 %v948_v2  ;;  %3155 = vmatprep.mubr.msk.bf16.mxu0 %vm3490_vm1, %v3489_v8 }
 0x4dc   : > { %3165 = vmatprep.subr.bf16.mxu0 %v3489_v8  ;;  %v941_v4 = vpack.c.bf16 %v940_v3, %v940_v3 }
 0x4e2   : > { %3156 = vmatmul.mubr.msk.bf16.vlgmr.msra.gmra.mrb[12].mxu0 %vm761_vm2, %v941_v4 }
 0x4e3   : > { %3167 = vmatprep.mubr.msk.bf16.mxu0 %vm3490_vm1, %v3489_v8  ;;  %3166 = vmatpush3.bf16.msra.mxu0 %v1041_v6 }
 0x4e4   : > { %3177 = vmatprep.subr.bf16.mxu0 %v3489_v8 }
 0x5ad   : > { %v871_v10 = vpop.f32.mrb[8].mxu0 }
 0x5ae   : > { %v877_v11 = vpack.c.bf16 %v871_v10, %v871_v10  ;;  %v3145_v12 = vpop.f32.mrb[9].mxu0 }
 0x5af   : > { %v874_v13 = vpop.f32.mrb[10].mxu0 }
 0x5b0   : > { %v3146_v14 = vpop.f32.mrb[11].mxu0  ;;  %3168 = vmatmul.mubr.msk.bf16.vlgmr.msra.gmra.mrb[16].mxu0 %vm761_vm2, %v877_v11 }
 0x5b1   : > { %3179 = vmatprep.mubr.msk.bf16.mxu0 %vm3490_vm1, %v3489_v8 }
 0x5b5   : > { %v984_v16 = vpop.f32.mrb[12].mxu0 }
 0x5b6   : > { %v990_v17 = vpack.c.bf16 %v984_v16, %v984_v16  ;;  %v3157_v19 = vpop.f32.mrb[13].mxu0 }
 0x5b7   : > { %v987_v20 = vpop.f32.mrb[14].mxu0 }
 0x5b8   : > { %v3158_v22 = vpop.f32.mrb[15].mxu0  ;;  %3162 = vmatmul.mubr.msk.bf16.vlgmr.msra.gmra.mrb[4].mxu1 %vm761_vm2, %v990_v17 }
 0x5b9   : > { %3172 = vmatpush3.bf16.xpose.msra.mxu1 %v1091_v21  ;;  %3173 = vmatprep.mubr.msk.bf16.mxu1 %vm3490_vm1, %v3489_v8 }
 0x5ba   : > { %3183 = vmatprep.subr.bf16.mxu1 %v3489_v8 }
 0x5c0   : > { %3174 = vmatmul.mubr.msk.bf16.vlgmr.msra.gmra.mrb[8].mxu1 %vm761_vm2, %v1084_v23 }
 0x5c1   : > { %3185 = vmatprep.mubr.msk.bf16.mxu1 %vm3490_vm1, %v3489_v8  ;;  %3184 = vmatpush3.bf16.msra.mxu1 %v1200_v57  ;;  %v3366_v57 = vld [vmem:[%s4122_s12] sm:$0xff]  }
 0x5c2   : > { %3195 = vmatprep.subr.bf16.mxu1 %v3489_v8 }
 0x683   : > { %v1077_v24 = vpop.f32.mrb[16].mxu0 }
 0x684   : > { %v3169_v26 = vpop.f32.mrb[17].mxu0 }
 0x685   : > { %v1080_v27 = vpop.f32.mrb[18].mxu0 }
 0x686   : > { %v3170_v28 = vpop.f32.mrb[19].mxu0 }
 0x68b   : > { %v1031_v29 = vpop.f32.mrb[4].mxu1 }
 0x68c   : > { %v3757_v30 = vadd.f32 %v1077_v24, %v1031_v29  ;;  %v3163_v31 = vpop.f32.mrb[5].mxu1 }
 0x68d   : > { %v1034_v33 = vpop.f32.mrb[6].mxu1 }
 0x68e   : > { %v3164_v34 = vpop.f32.mrb[7].mxu1  ;;  %v2942_v33 = vld [vmem:[%s4117_s7] ss:$0 sm:$0xff] }
 0x693   : > { %v1127_v35 = vpop.f32.mrb[8].mxu1 }
 0x694   : > { %v1133_v36 = vmul.f32 0.35355338, %v1127_v35  ;;  %v3175_v37 = vpop.f32.mrb[9].mxu1 }
 0x695   : > { %v1130_v38 = vpop.f32.mrb[10].mxu1 }
 0x696   : > { %v3176_v39 = vpop.f32.mrb[11].mxu1  ;;  %v1134_v40 = vadd.f32 %v3710_v32, %v1133_v36 }
 0x698   : > { %v1135_v41 = vsel %vm761_vm2, %v1134_v40, -inf }
 0x699   : > { %1136 = vmax.xlane.f32.xlu1 %v1135_v41 }
 0x6aa   : > { %1147 = vrot.lane.b32.xlu1 %v3687_v25, %s4135_s21  ;;  %s4158_s21 = smov 104  }
 0x6ae   : > { %1243 = vrot.lane.b32.xlu1 %v3687_v25, %s4136_s25  ;;  %s4159_s25 = smov 48  }
 0x726   : > { %v1137_v42 = vpop.xlane.xlu1 %1136 }
 0x727   : > { %v1138_v43 = vsub.f32 %v1134_v40, %v1137_v42 }
 0x729   : > { %v1139_v44 = vmul.f32 1.442695, %v1138_v43 }
 0x72a   : > { %v1148_v45 = vpop.permute.xlu1 %1147 }
 0x72b   : > { %3410 = vpow2.f32 %v1139_v44  ;;  %v1153_v46 = vsel %vm833_vm3, %v1148_v45, 0 }
 0x72c   : > { %3178 = vmatpush3.bf16.msra.mxu0 %v1153_v46  ;;  %v3364_v46 = vld [vmem:[%s4120_s10] sm:$0xff]  }
 0x72d   : > { %3189 = vmatprep.subr.bf16.mxu0 %v3489_v8 }
 0x72e   : > { %v1244_v55 = vpop.permute.xlu1 %1243 }
 0x735   : > { %v3411_v47 = vpop.eup %3410 }
 0x736   : > { %v1141_v48 = vsel %vm761_vm2, %v3411_v47, 0.0 }
 0x737   : > { %1142 = vadd.xlane.f32.xlu0 %v1141_v48 }
 0x74d   : > { %1245 = vrot.lane.b32.xlu0 %v3687_v25, %s4137_s24 }
 0x7c4   : > { %v1143_v49 = vpop.xlane.xlu0 %1142 }
 0x7c5   : > { %3412 = vrcp.f32 %v1143_v49 }
 0x7c8   : > { %v1246_v52 = vpop.permute.xlu0 %1245 }
 0x7c9   : > { %v1251_v54 = vsel %vm761_vm2, %v1246_v52, 0 }
 0x7cf   : > { %v3413_v50 = vpop.eup %3412 }
 0x7d0   : > { %v1145_v51 = vmul.f32 %v3413_v50, %v3411_v47  ;;  %v3365_v47 = vld [vmem:[%s4120_s10 + $0x8] sm:$0xff]  }
 0x7d2   : > { %v1146_v53 = vpack.c.bf16 %v1145_v51, %v1145_v51  ;;  %v2943_v51 = vld [vmem:[%s4118_s8] ss:$0 sm:$0xff] }
 0x7d4   : > { %3180 = vmatmul.mubr.msk.bf16.vlgmr.msra.gmra.mrb[20].mxu0 %vm761_vm2, %v1146_v53  ;;  %v2944_v53 = vld [vmem:[%s4119_s9] ss:$0 sm:$0xff] }
 0x7d5   : > { %3190 = vmatpush3.bf16.xpose.msra.mxu0 %v1251_v54  ;;  %3191 = vmatprep.mubr.msk.bf16.mxu0 %vm3490_vm1, %v3489_v8 }
 0x7d6   : > { %3201 = vmatprep.subr.bf16.mxu0 %v3489_v8 }
 0x7dc   : > { %3192 = vmatmul.mubr.msk.bf16.vlgmr.msra.gmra.mrb[24].mxu0 %vm761_vm2, %v1244_v55 }
 0x7dd   : > { %3203 = vmatprep.mubr.msk.bf16.mxu0 %vm3490_vm1, %v3489_v8 }
 0x8a7   : > { %v1189_v58 = vpop.f32.mrb[20].mxu0 }
 0x8a8   : > { %v1195_v59 = vpack.c.bf16 %v1189_v58, %v1189_v58  ;;  %v3181_v60 = vpop.f32.mrb[21].mxu0  ;;  %v3367_v58 = vld [vmem:[%s4122_s12 + $0x8] sm:$0xff]  }
 0x8a9   : > { %v1192_v61 = vpop.f32.mrb[22].mxu0  ;;  %v3369_v60 = vld [vmem:[%s4122_s12 + $0x18] sm:$0xff]  }
 0x8aa   : > { %v3182_v62 = vpop.f32.mrb[23].mxu0  ;;  %3186 = vmatmul.mubr.msk.bf16.vlgmr.msra.gmra.mrb[12].mxu1 %vm761_vm2, %v1195_v59  ;;  %v3368_v59 = vld [vmem:[%s4122_s12 + $0x10] sm:$0xff]   ;;  %v2945_v61 = vld [vmem:[%s4121_s11] ss:$0 sm:$0xff] }
 0x8ab   : > { %3197 = vmatprep.mubr.msk.bf16.mxu1 %vm3490_vm1, %v3489_v8 }
 0x8af   : > { %v1287_v63 = vpop.f32.mrb[24].mxu0 }
 0x8b0   : > { %v1293_v0 = vmul.f32 0.35355338, %v1287_v63  ;;  %v3193_v1 = vpop.f32.mrb[25].mxu0 }
 0x8b1   : > { %v1290_v2 = vpop.f32.mrb[26].mxu0 }
 0x8b2   : > { %v3194_v3 = vpop.f32.mrb[27].mxu0  ;;  %v1294_v4 = vadd.f32 %v3710_v32, %v1293_v0 }
 0x8b4   : > { %v1295_v5 = vsel %vm761_vm2, %v1294_v4, -inf }
 0x8b5   : > { %1296 = vmax.xlane.f32.xlu1 %v1295_v5 }
 0x942   : > { %v1297_v6 = vpop.xlane.xlu1 %1296 }
 0x943   : > { %v1298_v7 = vsub.f32 %v1294_v4, %v1297_v6 }
 0x945   : > { %v1299_v9 = vmul.f32 1.442695, %v1298_v7 }
 0x947   : > { %3414 = vpow2.f32 %v1299_v9 }
 0x951   : > { %v3415_v10 = vpop.eup %3414 }
 0x952   : > { %v1301_v11 = vsel %vm761_vm2, %v3415_v10, 0.0 }
 0x953   : > { %1302 = vadd.xlane.f32.xlu0 %v1301_v11 }
 0x969   : > { %1307 = vrot.lane.b32.xlu0 %v3687_v25, %s4134_s2  ;;  %v756_v25 = vld [vmem:[%s4116_s6 + $0xc] sm:$0xf]  ;;  %s4157_s2 = smov 72  }
 0x96a   : > { %v1360_v24 = vsel %vm833_vm3, %v756_v25, 0 }
 0x96b   : > { %3202 = vmatpush3.bf16.msra.mxu0 %v1360_v24 }
 0x96c   : > { %3215 = vmatprep.subr.bf16.mxu0 %v3489_v8 }
 0x97d   : > { %v1236_v12 = vpop.f32.mrb[12].mxu1 }
 0x97e   : > { %v1242_v13 = vadd.f32 %v1236_v12, %v3757_v30  ;;  %v3187_v14 = vpop.f32.mrb[13].mxu1 }
 0x97f   : > { %v1239_v15 = vpop.f32.mrb[14].mxu1  ;;  %v2949_v14 = vld [vmem:[%s4123_s13] ss:$0 sm:$0xff] }
 0x980   : > { %v3188_v16 = vpop.f32.mrb[15].mxu1 }
 0x9e0   : > { %v1303_v17 = vpop.xlane.xlu0 %1302 }
 0x9e1   : > { %3416 = vrcp.f32 %v1303_v17 }
 0x9e4   : > { %v1308_v19 = vpop.permute.xlu0 %1307 }
 0x9e5   : > { %v1313_v20 = vsel %vm833_vm3, %v1308_v19, 0 }
 0x9e6   : > { %3196 = vmatpush3.bf16.msra.mxu1 %v1313_v20 }
 0x9e7   : > { %3207 = vmatprep.subr.bf16.mxu1 %v3489_v8 }
 0x9eb   : > { %v3417_v21 = vpop.eup %3416 }
 0x9ec   : > { %v1305_v22 = vmul.f32 %v3417_v21, %v3415_v10 }
 0x9ee   : > { %v1306_v23 = vpack.c.bf16 %v1305_v22, %v1305_v22 }
 0x9f0   : > { %3198 = vmatmul.mubr.msk.bf16.vlgmr.msra.gmra.mrb[16].mxu1 %vm761_vm2, %v1306_v23 }
 0x9f1   : > { %3211 = vmatprep.mubr.msk.bf16.mxu1 %vm3490_vm1, %v3489_v8  ;;  %3208 = vmatpush3.bf16.msra.mxu1 %v3364_v46 }
 0x9f2   : > { %3209 = vmatprep.subr.bf16.mxu1 %v3489_v8 }
 0x9f5   : > { %3210 = vmatpush3.bf16.msra.mxu1 %v3365_v47 }
 0x9f6   : > { %3227 = vmatprep.subr.bf16.mxu1 %v3489_v8 }
 0xac3   : > { %v1349_v26 = vpop.f32.mrb[16].mxu1 }
 0xac4   : > { %v1355_v27 = vpack.c.bf16 %v1349_v26, %v1349_v26  ;;  %v3199_v28 = vpop.f32.mrb[17].mxu1 }
 0xac5   : > { %v1352_v29 = vpop.f32.mrb[18].mxu1  ;;  %v3370_v28 = vld [vmem:[#allocation2 + $0x10] sm:$0xff]  }
 0xac6   : > { %v3200_v30 = vpop.f32.mrb[19].mxu1  ;;  %3204 = vmatmul.mubr.msk.bf16.vlgmr.msra.gmra.mrb[28].mxu0 %vm761_vm2, %v1355_v27  ;;  %v3371_v29 = vld [vmem:[#allocation2 + $0x18] sm:$0xff]  }
 0xac7   : > { %3223 = vmatprep.mubr.msk.bf16.mxu0 %vm3490_vm1, %v3489_v8  ;;  %3216 = vmatpush3.bf16.msra.mxu0 %v3366_v57 }
 0xac8   : > { %3217 = vmatprep.subr.bf16.mxu0 %v3489_v8 }
 0xacb   : > { %3218 = vmatpush3.bf16.msra.mxu0 %v3367_v58 }
 0xacc   : > { %3219 = vmatprep.subr.bf16.mxu0 %v3489_v8 }
 0xacf   : > { %3220 = vmatpush3.bf16.msra.mxu0 %v3368_v59 }
 0xad0   : > { %3221 = vmatprep.subr.bf16.mxu0 %v3489_v8 }
 0xad3   : > { %3222 = vmatpush3.bf16.msra.mxu0 %v3369_v60 }
 0xad4   : > { %3241 = vmatprep.subr.bf16.mxu0 %v3489_v8 }
 0xb99   : > { %v1396_v31 = vpop.f32.mrb[28].mxu0 }
 0xb9a   : > { %v1402_v34 = vadd.f32 %v1396_v31, %v1242_v13  ;;  %v3205_v35 = vpop.f32.mrb[29].mxu0 }
 0xb9b   : > { %v1399_v36 = vpop.f32.mrb[30].mxu0  ;;  %v2955_v35 = vld [vmem:[%s4124_s14] ss:$0 sm:$0xff] }
 0xb9c   : > { %v1410_v37 = vadd.f32 %v2942_v33, %v1402_v34  ;;  %v3206_v38 = vpop.f32.mrb[31].mxu0 }
 0xb9e   : > { %v1411_v39 = vadd.f32 %v1410_v37, %v3677_v18  ;;  %v2956_v37 = vld [vmem:[%s4125_s15] ss:$0 sm:$0xff] }
 0xba0   : > { %v1414_v40 = vsel %vm656_vm0, %v1411_v39, 0.0 }
 0xba1   : > { %1415 = vadd.xlane.f32.xlu1 %v1414_v40 }
 0xc2e   : > { %v1416_v41 = vpop.xlane.xlu1 %1415 }
 0xc2f   : > { %v1417_v42 = vmul.f32 0.03125, %v1416_v41  ;;  %v2958_v41 = vld [vmem:[%s4115_s5 + $0x1] ss:$0 sm:$0xff] }
 0xc31   : > { %v1418_v43 = vsub.f32 %v1411_v39, %v1417_v42 }
 0xc33   : > { %v1419_v44 = vmul.f32 %v1418_v43, %v1418_v43 }
 0xc35   : > { %v1420_v45 = vsel %vm656_vm0, %v1419_v44, 0.0 }
 0xc36   : > { %1421 = vadd.xlane.f32.xlu1 %v1420_v45 }
 0xcc3   : > { %v1422_v18 = vpop.xlane.xlu1 %1421 }
 0xcc4   : > { %v1423_v48 = vmul.f32 0.03125, %v1422_v18 }
 0xcc6   : > { %v1424_v49 = vadd.f32 1e-12, %v1423_v48 }
 0xcc8   : > { %3418 = vrsqrt.f32 %v1424_v49 }
 0xcd2   : > { %v3419_v50 = vpop.eup %3418 }
 0xcd3   : > { %v1426_v52 = vmul.f32 %v3419_v50, %v1418_v43 }
 0xcd5   : > { %v1433_v54 = vmul.f32 %v2943_v51, %v1426_v52 }
 0xcd7   : > { %v1440_v55 = vadd.f32 %v2944_v53, %v1433_v54 }
 0xcd9   : > { %v1441_v56 = vpack.c.bf16 %v1440_v55, %v1440_v55 }
 0xcdb   : > { %3212 = vmatmul.mubr.msk.bf16.vlgmr.msra.gmra.mrb[20].mxu1 %vm656_vm0, %v1441_v56 }
 0xcdc   : > { %3231 = vmatprep.mubr.msk.bf16.mxu1 %vm3490_vm1, %v3489_v8  ;;  %3228 = vmatpush3.bf16.msra.mxu1 %v3370_v28  ;;  %v2963_v28 = vld [vmem:[%s4116_s6 + $0x14] sm:$0xf] }
 0xcdd   : > { %3229 = vmatprep.subr.bf16.mxu1 %v3489_v8 }
 0xce0   : > { %3230 = vmatpush3.bf16.msra.mxu1 %v3371_v29  ;;  %v1935_v29 = vsel %vm833_vm3, %v2963_v28, 0 }
 0xce1   : > { %3235 = vmatprep.subr.bf16.mxu1 %v3489_v8 }
 0xdae   : > { %v1502_v62 = vpop.f32.mrb[20].mxu1 }
 0xdaf   : > { %v1503_v63 = vadd.f32 %v2945_v61, %v1502_v62  ;;  %v3213_v0 = vpop.f32.mrb[21].mxu1 }
 0xdb0   : > { %v1505_v1 = vpop.f32.mrb[22].mxu1 }
 0xdb1   : > { %v1508_v2 = vmul.f32 %v1503_v63, %v1503_v63  ;;  %v3214_v3 = vpop.f32.mrb[23].mxu1 }
 0xdb3   : > { %v1509_v4 = vmul.f32 %v1508_v2, %v1503_v63 }
 0xdb5   : > { %v1510_v5 = vmul.f32 0.044715, %v1509_v4 }
 0xdb7   : > { %v1511_v6 = vadd.f32 %v1510_v5, %v1503_v63 }
 0xdb9   : > { %v1512_v7 = vmul.f32 0.7978846, %v1511_v6 }
 0xdbb   : > { %3420 = vtanh.f32 %v1512_v7 }
 0xdc5   : > { %v3421_v9 = vpop.eup %3420 }
 0xdc6   : > { %v1514_v10 = vadd.f32 1.0, %v3421_v9 }
 0xdc8   : > { %v1515_v11 = vmul.f32 0.5, %v1514_v10 }
 0xdca   : > { %v1516_v12 = vmul.f32 %v1515_v11, %v1503_v63 }
 0xdcc   : > { %v1517_v13 = vpack.c.bf16 %v1516_v12, %v1516_v12 }
 0xdce   : > { %3224 = vmatmul.mubr.msk.bf16.vlgmr.msra.gmra.mrb[32].mxu0 %vm1557_vm4, %v1517_v13 }
 0xdcf   : > { %3243 = vmatprep.mubr.msk.bf16.mxu0 %vm3490_vm1, %v3489_v8 }
 0xea1   : > { %v1595_v15 = vpop.f32.mrb[32].mxu0 }
 0xea2   : > { %v1596_v16 = vadd.f32 %v2949_v14, %v1595_v15  ;;  %v3225_v17 = vpop.f32.mrb[33].mxu0 }
 0xea3   : > { %v1598_v19 = vpop.f32.mrb[34].mxu0 }
 0xea4   : > { %v3226_v20 = vpop.f32.mrb[35].mxu0  ;;  %v1601_v21 = vadd.f32 %v1596_v16, %v1440_v55 }
 0xea6   : > { %v1604_v22 = vsel %vm656_vm0, %v1601_v21, 0.0 }
 0xea7   : > { %1605 = vadd.xlane.f32.xlu1 %v1604_v22 }
 0xf34   : > { %v1606_v23 = vpop.xlane.xlu1 %1605 }
 0xf35   : > { %v1607_v25 = vmul.f32 0.03125, %v1606_v23 }
 0xf37   : > { %v1608_v24 = vsub.f32 %v1601_v21, %v1607_v25 }
 0xf39   : > { %v1609_v26 = vmul.f32 %v1608_v24, %v1608_v24 }
 0xf3b   : > { %v1610_v27 = vsel %vm656_vm0, %v1609_v26, 0.0  ;;  %v2962_v26 = vld [vmem:[%s4116_s6 + $0x10] sm:$0xf] }
 0xf3c   : > { %1611 = vadd.xlane.f32.xlu1 %v1610_v27  ;;  %v1981_v27 = vsel %vm833_vm3, %v2962_v26, 0 }
 0xfc9   : > { %v1612_v30 = vpop.xlane.xlu1 %1611 }
 0xfca   : > { %v1613_v31 = vmul.f32 0.03125, %v1612_v30 }
 0xfcc   : > { %v1614_v33 = vadd.f32 1e-12, %v1613_v31 }
 0xfce   : > { %3422 = vrsqrt.f32 %v1614_v33 }
 0xfd8   : > { %v3423_v34 = vpop.eup %3422 }
 0xfd9   : > { %v1616_v36 = vmul.f32 %v3423_v34, %v1608_v24 }
 0xfdb   : > { %v1623_v38 = vmul.f32 %v2955_v35, %v1616_v36 }
 0xfdd   : > { %v3863_v39 = vadd.f32 %v2956_v37, %v1623_v38 }
 0xfdf   : > { %v1631_v40 = vpack.c.bf16 %v3863_v39, %v3863_v39 }
 0xfe1   : > { %3232 = vmatmul.mubr.msk.bf16.vlgmr.msra.gmra.mrb[24].mxu1 %vm656_vm0, %v1631_v40 }
 0xfe2   : > { %3237 = vmatprep.mubr.msk.bf16.mxu1 %vm3490_vm1, %v3489_v8 }
0x10b4   : > { %v1694_v42 = vpop.f32.mrb[24].mxu1 }
0x10b5   : > { %v1695_v43 = vadd.f32 %v2958_v41, %v1694_v42  ;;  %v3233_v44 = vpop.f32.mrb[25].mxu1 }
0x10b6   : > { %v1697_v45 = vpop.f32.mrb[26].mxu1 }
0x10b7   : > { %v3873_v46 = vpack.c.bf16 %v1695_v43, %v1695_v43  ;;  %v3234_v47 = vpop.f32.mrb[27].mxu1 }
0x10b9   : > { %1820 = vrot.lane.b32.xlu0 %v3873_v46, %s3493_s30  ;;  %1707 = vrot.lane.b32.xlu1 %v3873_v46, %s3492_s29  ;;  %s4156_s29 = smov 112   ;;  %s651_s30 = scalar_lea.vmem %s4130_s20, %s4162_s22 }
0x10bd   : > { %1818 = vrot.lane.b32.xlu0 %v3873_v46, %s3491_s28  ;;  %s4155_s28 = smov 64  }
0x112b   : > { %v1708_v18 = vpop.permute.xlu1 %1707  ;;  %v1821_v49 = vpop.permute.xlu0 %1820 }
0x112c   : > { %v1713_v48 = vsel %vm761_vm2, %v1708_v18, 0  ;;  %v1826_v50 = vsel %vm761_vm2, %v1821_v49, 0 }
0x112d   : > { %3236 = vmatpush3.bf16.xpose.msra.mxu1 %v1713_v48 }
0x112e   : > { %3247 = vmatprep.subr.bf16.mxu1 %v3489_v8 }
0x112f   : > { %v1819_v51 = vpop.permute.xlu0 %1818 }
0x1134   : > { %3238 = vmatmul.mubr.msk.bf16.vlgmr.msra.gmra.mrb[28].mxu1 %vm761_vm2, %v3873_v46 }
0x1135   : > { %3248 = vmatpush3.bf16.xpose.msra.mxu1 %v1826_v50  ;;  %3249 = vmatprep.mubr.msk.bf16.mxu1 %vm3490_vm1, %v3489_v8 }
0x1136   : > { %3259 = vmatprep.subr.bf16.mxu1 %v3489_v8 }
0x113c   : > { %3250 = vmatmul.mubr.msk.bf16.vlgmr.msra.gmra.mrb[32].mxu1 %vm761_vm2, %v1819_v51 }
0x113d   : > { %3261 = vmatprep.mubr.msk.bf16.mxu1 %vm3490_vm1, %v3489_v8  ;;  %3260 = vmatpush3.bf16.msra.mxu1 %v1935_v29 }
0x113e   : > { %3271 = vmatprep.subr.bf16.mxu1 %v3489_v8 }
0x1207   : > { %v1749_v52 = vpop.f32.mrb[28].mxu1 }
0x1208   : > { %v1755_v53 = vmul.f32 0.35355338, %v1749_v52  ;;  %v3239_v54 = vpop.f32.mrb[29].mxu1 }
0x1209   : > { %v1752_v55 = vpop.f32.mrb[30].mxu1 }
0x120a   : > { %v3240_v56 = vpop.f32.mrb[31].mxu1  ;;  %v1756_v57 = vadd.f32 %v3710_v32, %v1755_v53 }
0x120c   : > { %v1757_v58 = vsel %vm761_vm2, %v1756_v57, -inf }
0x120d   : > { %1758 = vmax.xlane.f32.xlu0 %v1757_v58 }
0x120f   : > { %v1862_v59 = vpop.f32.mrb[32].mxu1 }
0x1210   : > { %v1868_v60 = vmul.f32 0.35355338, %v1862_v59  ;;  %v3251_v61 = vpop.f32.mrb[33].mxu1 }
0x1211   : > { %v1865_v62 = vpop.f32.mrb[34].mxu1 }
0x1212   : > { %v3252_v63 = vpop.f32.mrb[35].mxu1  ;;  %v1869_v0 = vadd.f32 %v3710_v32, %v1868_v60 }
0x1214   : > { %v1870_v1 = vsel %vm761_vm2, %v1869_v0, -inf }
0x1215   : > { %1871 = vmax.xlane.f32.xlu1 %v1870_v1 }
0x1226   : > { %1882 = vrot.lane.b32.xlu1 %v3873_v46, %s3494_s23 }
0x122a   : > { %2025 = vrot.lane.b32.xlu1 %v3873_v46, %s3496_s26 }
0x129a   : > { %v1759_v2 = vpop.xlane.xlu0 %1758 }
0x129b   : > { %v1760_v3 = vsub.f32 %v1756_v57, %v1759_v2 }
0x129d   : > { %v1761_v4 = vmul.f32 1.442695, %v1760_v3 }
0x129f   : > { %3424 = vpow2.f32 %v1761_v4 }
0x12a2   : > { %v1872_v5 = vpop.xlane.xlu1 %1871 }
0x12a3   : > { %v1873_v6 = vsub.f32 %v1869_v0, %v1872_v5 }
0x12a5   : > { %v1874_v7 = vmul.f32 1.442695, %v1873_v6 }
0x12a6   : > { %v1883_v20 = vpop.permute.xlu1 %1882 }
0x12a7   : > { %3426 = vpow2.f32 %v1874_v7  ;;  %v1888_v22 = vsel %vm833_vm3, %v1883_v20, 0 }
0x12a9   : > { %v3425_v9 = vpop.eup %3424 }
0x12aa   : > { %v1763_v10 = vsel %vm761_vm2, %v3425_v9, 0.0  ;;  %v2026_v36 = vpop.permute.xlu1 %2025 }
0x12ab   : > { %1764 = vadd.xlane.f32.xlu0 %v1763_v10  ;;  %v2031_v42 = vsel %vm761_vm2, %v2026_v36, 0 }
0x12b1   : > { %v3427_v11 = vpop.eup %3426 }
0x12b2   : > { %v1876_v12 = vsel %vm761_vm2, %v3427_v11, 0.0 }
0x12b3   : > { %1877 = vadd.xlane.f32.xlu0 %v1876_v12  ;;  %v2964_v12 = vld [vmem:[%s4116_s6 + $0x18] sm:$0xf] }
0x12c9   : > { %1769 = vrot.lane.b32.xlu0 %v3873_v46, %s4155_s28 }
0x12cd   : > { %2023 = vrot.lane.b32.xlu0 %v3873_v46, %s4156_s29 }
0x1338   : > { %v1765_v13 = vpop.xlane.xlu0 %1764 }
0x1339   : > { %3428 = vrcp.f32 %v1765_v13  ;;  %v2140_v13 = vsel %vm833_vm3, %v2964_v12, 0  ;;  %v3374_v12 = vld [vmem:[%s4122_s12 + $0x20] sm:$0xff]  }
0x1340   : > { %v1878_v14 = vpop.xlane.xlu0 %1877 }
0x1341   : > { %3430 = vrcp.f32 %v1878_v14 }
0x1343   : > { %v3429_v15 = vpop.eup %3428 }
0x1344   : > { %v1767_v16 = vmul.f32 %v3429_v15, %v3425_v9  ;;  %v1770_v17 = vpop.permute.xlu0 %1769 }
0x1345   : > { %v1775_v19 = vsel %vm833_vm3, %v1770_v17, 0 }
0x1346   : > { %3242 = vmatpush3.bf16.msra.mxu0 %v1775_v19  ;;  %v1768_v21 = vpack.c.bf16 %v1767_v16, %v1767_v16 }
0x1347   : > { %3253 = vmatprep.subr.bf16.mxu0 %v3489_v8 }
0x1348   : > { %v2024_v44 = vpop.permute.xlu0 %2023 }
0x1349   : > { %3244 = vmatmul.mubr.msk.bf16.vlgmr.msra.gmra.mrb[36].mxu0 %vm761_vm2, %v1768_v21 }
0x134a   : > { %3254 = vmatpush3.bf16.msra.mxu0 %v1888_v22  ;;  %3255 = vmatprep.mubr.msk.bf16.mxu0 %vm3490_vm1, %v3489_v8 }
0x134b   : > { %v3431_v23 = vpop.eup %3430  ;;  %3265 = vmatprep.subr.bf16.mxu0 %v3489_v8 }
0x134c   : > { %v1880_v25 = vmul.f32 %v3431_v23, %v3427_v11 }
0x134e   : > { %v1881_v24 = vpack.c.bf16 %v1880_v25, %v1880_v25 }
0x1351   : > { %3256 = vmatmul.mubr.msk.bf16.vlgmr.msra.gmra.mrb[40].mxu0 %vm761_vm2, %v1881_v24 }
0x1352   : > { %3267 = vmatprep.mubr.msk.bf16.mxu0 %vm3490_vm1, %v3489_v8  ;;  %3266 = vmatpush3.bf16.msra.mxu0 %v1981_v27 }
0x1353   : > { %3277 = vmatprep.subr.bf16.mxu0 %v3489_v8 }
0x141c   : > { %v1811_v30 = vpop.f32.mrb[36].mxu0 }
0x141d   : > { %v1817_v31 = vpack.c.bf16 %v1811_v30, %v1811_v30  ;;  %v3245_v33 = vpop.f32.mrb[37].mxu0 }
0x141e   : > { %v1814_v34 = vpop.f32.mrb[38].mxu0 }
0x141f   : > { %v3246_v35 = vpop.f32.mrb[39].mxu0  ;;  %3268 = vmatmul.mubr.msk.bf16.vlgmr.msra.gmra.mrb[44].mxu0 %vm761_vm2, %v1817_v31 }
0x1420   : > { %3279 = vmatprep.mubr.msk.bf16.mxu0 %vm3490_vm1, %v3489_v8 }
0x1424   : > { %v1924_v37 = vpop.f32.mrb[40].mxu0 }
0x1425   : > { %v1930_v38 = vpack.c.bf16 %v1924_v37, %v1924_v37  ;;  %v3257_v40 = vpop.f32.mrb[41].mxu0 }
0x1426   : > { %v1927_v41 = vpop.f32.mrb[42].mxu0 }
0x1427   : > { %v3258_v43 = vpop.f32.mrb[43].mxu0  ;;  %3262 = vmatmul.mubr.msk.bf16.vlgmr.msra.gmra.mrb[36].mxu1 %vm761_vm2, %v1930_v38 }
0x1428   : > { %3272 = vmatpush3.bf16.xpose.msra.mxu1 %v2031_v42  ;;  %3273 = vmatprep.mubr.msk.bf16.mxu1 %vm3490_vm1, %v3489_v8  ;;  %v2965_v43 = vld [vmem:[%s4116_s6 + $0x1c] sm:$0xf] }
0x1429   : > { %3283 = vmatprep.subr.bf16.mxu1 %v3489_v8 }
0x142f   : > { %3274 = vmatmul.mubr.msk.bf16.vlgmr.msra.gmra.mrb[40].mxu1 %vm761_vm2, %v2024_v44  ;;  %v2300_v44 = vsel %vm833_vm3, %v2965_v43, 0 }
0x1430   : > { %3285 = vmatprep.mubr.msk.bf16.mxu1 %vm3490_vm1, %v3489_v8  ;;  %3284 = vmatpush3.bf16.msra.mxu1 %v2140_v13  ;;  %v3375_v13 = vld [vmem:[%s4122_s12 + $0x28] sm:$0xff]  }
0x1431   : > { %3295 = vmatprep.subr.bf16.mxu1 %v3489_v8 }
0x14f2   : > { %v2017_v45 = vpop.f32.mrb[44].mxu0 }
0x14f3   : > { %v3269_v47 = vpop.f32.mrb[45].mxu0 }
0x14f4   : > { %v2020_v18 = vpop.f32.mrb[46].mxu0 }
0x14f5   : > { %v3270_v48 = vpop.f32.mrb[47].mxu0 }
0x14fa   : > { %v1971_v49 = vpop.f32.mrb[36].mxu1 }
0x14fb   : > { %v3937_v50 = vadd.f32 %v2017_v45, %v1971_v49  ;;  %v3263_v51 = vpop.f32.mrb[37].mxu1 }
0x14fc   : > { %v1974_v52 = vpop.f32.mrb[38].mxu1  ;;  %v2979_v51 = vld [vmem:[%s4117_s7 + $0x1] ss:$0 sm:$0xff] }
0x14fd   : > { %v3264_v53 = vpop.f32.mrb[39].mxu1 }
0x1502   : > { %v2067_v54 = vpop.f32.mrb[40].mxu1 }
0x1503   : > { %v2073_v55 = vmul.f32 0.35355338, %v2067_v54  ;;  %v3275_v56 = vpop.f32.mrb[41].mxu1 }
0x1504   : > { %v2070_v57 = vpop.f32.mrb[42].mxu1 }
0x1505   : > { %v3276_v58 = vpop.f32.mrb[43].mxu1  ;;  %v2074_v59 = vadd.f32 %v3710_v32, %v2073_v55 }
0x1507   : > { %v2075_v60 = vsel %vm761_vm2, %v2074_v59, -inf }
0x1508   : > { %2076 = vmax.xlane.f32.xlu1 %v2075_v60 }
0x1519   : > { %2185 = vrot.lane.b32.xlu1 %v3873_v46, %s4157_s2 }
0x151d   : > { %2183 = vrot.lane.b32.xlu1 %v3873_v46, %s4158_s21 }
0x1595   : > { %v2077_v61 = vpop.xlane.xlu1 %2076 }
0x1596   : > { %v2078_v62 = vsub.f32 %v2074_v59, %v2077_v61 }
0x1598   : > { %v2079_v63 = vmul.f32 1.442695, %v2078_v62 }
0x1599   : > { %v2186_v7 = vpop.permute.xlu1 %2185 }
0x159a   : > { %3432 = vpow2.f32 %v2079_v63  ;;  %v2191_v10 = vsel %vm761_vm2, %v2186_v7, 0  ;;  %v2983_v7 = vld [vmem:[%s4119_s9 + $0x1] ss:$0 sm:$0xff] }
0x159d   : > { %v2184_v11 = vpop.permute.xlu1 %2183 }
0x15a4   : > { %v3433_v0 = vpop.eup %3432 }
0x15a5   : > { %v2081_v1 = vsel %vm761_vm2, %v3433_v0, 0.0 }
0x15a6   : > { %2082 = vadd.xlane.f32.xlu0 %v2081_v1  ;;  %v3373_v1 = vld [vmem:[%s4120_s10 + $0x18] sm:$0xff]  }
0x15bc   : > { %2087 = vrot.lane.b32.xlu0 %v3873_v46, %s4159_s25 }
0x1633   : > { %v2083_v2 = vpop.xlane.xlu0 %2082 }
0x1634   : > { %3434 = vrcp.f32 %v2083_v2 }
0x1637   : > { %v2088_v3 = vpop.permute.xlu0 %2087 }
0x1638   : > { %v2093_v4 = vsel %vm833_vm3, %v2088_v3, 0 }
0x1639   : > { %3278 = vmatpush3.bf16.msra.mxu0 %v2093_v4 }
0x163a   : > { %3289 = vmatprep.subr.bf16.mxu0 %v3489_v8 }
0x163e   : > { %v3435_v5 = vpop.eup %3434 }
0x163f   : > { %v2085_v6 = vmul.f32 %v3435_v5, %v3433_v0  ;;  %v3372_v0 = vld [vmem:[%s4120_s10 + $0x10] sm:$0xff]   ;;  %v2982_v5 = vld [vmem:[%s4118_s8 + $0x1] ss:$0 sm:$0xff] }
0x1641   : > { %v2086_v9 = vpack.c.bf16 %v2085_v6, %v2085_v6 }
0x1643   : > { %3280 = vmatmul.mubr.msk.bf16.vlgmr.msra.gmra.mrb[48].mxu0 %vm761_vm2, %v2086_v9 }
0x1644   : > { %3290 = vmatpush3.bf16.xpose.msra.mxu0 %v2191_v10  ;;  %3291 = vmatprep.mubr.msk.bf16.mxu0 %vm3490_vm1, %v3489_v8 }
0x1645   : > { %3301 = vmatprep.subr.bf16.mxu0 %v3489_v8 }
0x164b   : > { %3292 = vmatmul.mubr.msk.bf16.vlgmr.msra.gmra.mrb[52].mxu0 %vm761_vm2, %v2184_v11 }
0x164c   : > { %3303 = vmatprep.mubr.msk.bf16.mxu0 %vm3490_vm1, %v3489_v8  ;;  %3302 = vmatpush3.bf16.msra.mxu0 %v2300_v44 }
0x164d   : > { %3315 = vmatprep.subr.bf16.mxu0 %v3489_v8 }
0x1716   : > { %v2129_v14 = vpop.f32.mrb[48].mxu0 }
0x1717   : > { %v2135_v15 = vpack.c.bf16 %v2129_v14, %v2129_v14  ;;  %v3281_v16 = vpop.f32.mrb[49].mxu0  ;;  %v3376_v14 = vld [vmem:[%s4122_s12 + $0x30] sm:$0xff]  }
0x1718   : > { %v2132_v17 = vpop.f32.mrb[50].mxu0  ;;  %v2989_v16 = vld [vmem:[%s4121_s11 + $0x1] ss:$0 sm:$0xff] }
0x1719   : > { %v3282_v19 = vpop.f32.mrb[51].mxu0  ;;  %3286 = vmatmul.mubr.msk.bf16.vlgmr.msra.gmra.mrb[44].mxu1 %vm761_vm2, %v2135_v15  ;;  %v3377_v15 = vld [vmem:[%s4122_s12 + $0x38] sm:$0xff]  }
0x171a   : > { %3297 = vmatprep.mubr.msk.bf16.mxu1 %vm3490_vm1, %v3489_v8 }
0x171e   : > { %v2227_v20 = vpop.f32.mrb[52].mxu0 }
0x171f   : > { %v2233_v21 = vmul.f32 0.35355338, %v2227_v20  ;;  %v3293_v22 = vpop.f32.mrb[53].mxu0 }
0x1720   : > { %v2230_v23 = vpop.f32.mrb[54].mxu0 }
0x1721   : > { %v3294_v25 = vpop.f32.mrb[55].mxu0  ;;  %v2234_v24 = vadd.f32 %v3710_v32, %v2233_v21 }
0x1723   : > { %v2235_v26 = vsel %vm761_vm2, %v2234_v24, -inf }
0x1724   : > { %2236 = vmax.xlane.f32.xlu0 %v2235_v26 }
0x173a   : > { %2247 = vrot.lane.b32.xlu0 %v3873_v46, %s4160_s3 }
0x17b1   : > { %v2237_v27 = vpop.xlane.xlu0 %2236 }
0x17b2   : > { %v2238_v28 = vsub.f32 %v2234_v24, %v2237_v27 }
0x17b4   : > { %v2239_v29 = vmul.f32 1.442695, %v2238_v28 }
0x17b5   : > { %v2248_v30 = vpop.permute.xlu0 %2247 }
0x17b6   : > { %3436 = vpow2.f32 %v2239_v29  ;;  %v2253_v31 = vsel %vm833_vm3, %v2248_v30, 0 }
0x17b7   : > { %3296 = vmatpush3.bf16.msra.mxu1 %v2253_v31 }
0x17b8   : > { %3307 = vmatprep.subr.bf16.mxu1 %v3489_v8 }
0x17c0   : > { %v3437_v33 = vpop.eup %3436 }
0x17c1   : > { %v2241_v34 = vsel %vm761_vm2, %v3437_v33, 0.0 }
0x17c2   : > { %2242 = vadd.xlane.f32.xlu1 %v2241_v34 }
0x17ec   : > { %v2176_v32 = vpop.f32.mrb[44].mxu1 }
0x17ed   : > { %v2182_v35 = vadd.f32 %v2176_v32, %v3937_v50  ;;  %v3287_v36 = vpop.f32.mrb[45].mxu1 }
0x17ee   : > { %v2179_v37 = vpop.f32.mrb[46].mxu1 }
0x17ef   : > { %v3288_v46 = vpop.f32.mrb[47].mxu1 }
0x184f   : > { %v2243_v38 = vpop.xlane.xlu1 %2242 }
0x1850   : > { %3438 = vrcp.f32 %v2243_v38 }
0x185a   : > { %v3439_v40 = vpop.eup %3438 }
0x185b   : > { %v2245_v41 = vmul.f32 %v3439_v40, %v3437_v33  ;;  %v3002_v33 = vld [vmem:[%s4123_s13 + $0x1] ss:$0 sm:$0xff] }
0x185d   : > { %v2246_v42 = vpack.c.bf16 %v2245_v41, %v2245_v41 }
0x185f   : > { %3298 = vmatmul.mubr.msk.bf16.vlgmr.msra.gmra.mrb[48].mxu1 %vm761_vm2, %v2246_v42 }
0x1860   : > { %3311 = vmatprep.mubr.msk.bf16.mxu1 %vm3490_vm1, %v3489_v8  ;;  %3308 = vmatpush3.bf16.msra.mxu1 %v3372_v0 }
0x1861   : > { %3309 = vmatprep.subr.bf16.mxu1 %v3489_v8 }
0x1864   : > { %3310 = vmatpush3.bf16.msra.mxu1 %v3373_v1 }
0x1932   : > { %v2289_v45 = vpop.f32.mrb[48].mxu1 }
0x1933   : > { %v2295_v47 = vpack.c.bf16 %v2289_v45, %v2289_v45  ;;  %v3299_v18 = vpop.f32.mrb[49].mxu1  ;;  %v3378_v45 = vld [vmem:[%s4126_s16] ss:$8 sps:$4 sm:$0xff]  }
0x1934   : > { %v2292_v48 = vpop.f32.mrb[50].mxu1  ;;  %v3383_v18 = vld [vmem:[%s4126_s16 + $0x14] ss:$8 sps:$4 sm:$0xff]  }
0x1935   : > { %v3300_v49 = vpop.f32.mrb[51].mxu1  ;;  %3304 = vmatmul.mubr.msk.bf16.vlgmr.msra.gmra.mrb[56].mxu0 %vm761_vm2, %v2295_v47  ;;  %v3380_v47 = vld [vmem:[%s4126_s16 + $0x4] ss:$8 sps:$4 sm:$0xff]   ;;  %v3502_v48 = vmov 0  }
0x1936   : > { %3323 = vmatprep.mubr.msk.bf16.mxu0 %vm3490_vm1, %v3489_v8  ;;  %3316 = vmatpush3.bf16.msra.mxu0 %v3374_v12  ;;  %v3381_v49 = vld [vmem:[%s4126_s16 + $0x10] ss:$8 sps:$4 sm:$0xff]   ;;  %v3392_v12 = vld [vmem:[%s4128_s18 + $0x60] sm:$0xff]  }
0x1937   : > { %3317 = vmatprep.subr.bf16.mxu0 %v3489_v8  ;;  %2628 = vmatprep.subr.bf16.mxu1 %v3380_v47 }
0x193a   : > { %3318 = vmatpush3.bf16.msra.mxu0 %v3375_v13  ;;  %v3393_v13 = vld [vmem:[%s4128_s18 + $0x20] sm:$0xff]  }
0x193b   : > { %3319 = vmatprep.subr.bf16.mxu0 %v3489_v8 }
0x193e   : > { %3320 = vmatpush3.bf16.msra.mxu0 %v3376_v14  ;;  %v3394_v14 = vld [vmem:[%s4128_s18 + $0x68] sm:$0xff]  }
0x193f   : > { %3321 = vmatprep.subr.bf16.mxu0 %v3489_v8 }
0x1942   : > { %3322 = vmatpush3.bf16.msra.mxu0 %v3377_v15  ;;  %v3395_v15 = vld [vmem:[%s4128_s18 + $0x28] sm:$0xff]  }
0x1a08   : > { %v2336_v50 = vpop.f32.mrb[56].mxu0 }
0x1a09   : > { %v2342_v52 = vadd.f32 %v2336_v50, %v2182_v35  ;;  %v3305_v53 = vpop.f32.mrb[57].mxu0  ;;  %v3384_v50 = vld [vmem:[%s4128_s18 + $0x40] sm:$0xff]  }
0x1a0a   : > { %v2339_v54 = vpop.f32.mrb[58].mxu0 }
0x1a0b   : > { %v2351_v55 = vadd.f32 %v2979_v51, %v2342_v52  ;;  %v3306_v56 = vpop.f32.mrb[59].mxu0 }
0x1a0d   : > { %v2352_v57 = vadd.f32 %v2351_v55, %v3863_v39  ;;  %v3010_v55 = vld [vmem:[%s4124_s14 + $0x1] ss:$0 sm:$0xff] }
0x1a0f   : > { %v2357_v58 = vsel %vm656_vm0, %v2352_v57, 0.0 }
0x1a10   : > { %2358 = vadd.xlane.f32.xlu1 %v2357_v58 }
0x1a9d   : > { %v2359_v59 = vpop.xlane.xlu1 %2358 }
0x1a9e   : > { %v2360_v60 = vmul.f32 0.03125, %v2359_v59 }
0x1aa0   : > { %v2361_v61 = vsub.f32 %v2352_v57, %v2360_v60  ;;  %v3011_v57 = vld [vmem:[%s4125_s15 + $0x1] ss:$0 sm:$0xff] }
0x1aa2   : > { %v2362_v62 = vmul.f32 %v2361_v61, %v2361_v61 }
0x1aa4   : > { %v2363_v63 = vsel %vm656_vm0, %v2362_v62, 0.0 }
0x1aa5   : > { %2364 = vadd.xlane.f32.xlu1 %v2363_v63 }
0x1b32   : > { %v2365_v39 = vpop.xlane.xlu1 %2364 }
0x1b33   : > { %v2366_v2 = vmul.f32 0.03125, %v2365_v39 }
0x1b35   : > { %v2367_v3 = vadd.f32 1e-12, %v2366_v2 }
0x1b37   : > { %3440 = vrsqrt.f32 %v2367_v3  ;;  %v3385_v3 = vld [vmem:[%s4128_s18] sm:$0xff]  }
0x1b41   : > { %v3441_v4 = vpop.eup %3440 }
0x1b42   : > { %v2369_v6 = vmul.f32 %v3441_v4, %v2361_v61 }
0x1b44   : > { %v2376_v9 = vmul.f32 %v2982_v5, %v2369_v6  ;;  %v3386_v5 = vld [vmem:[%s4128_s18 + $0x48] sm:$0xff]  }
0x1b45   : > { %v3387_v6 = vld [vmem:[%s4128_s18 + $0x8] sm:$0xff]  }
0x1b46   : > { %v2383_v10 = vadd.f32 %v2983_v7, %v2376_v9  ;;  %v3388_v7 = vld [vmem:[%s4128_s18 + $0x50] sm:$0xff]  }
0x1b47   : > { %v3389_v9 = vld [vmem:[%s4128_s18 + $0x10] sm:$0xff]  }
0x1b48   : > { %v2384_v11 = vpack.c.bf16 %v2383_v10, %v2383_v10 }
0x1b4a   : > { %3312 = vmatmul.mubr.msk.bf16.vlgmr.msra.gmra.mrb[52].mxu1 %vm656_vm0, %v2384_v11  ;;  %v3391_v11 = vld [vmem:[%s4128_s18 + $0x18] sm:$0xff]  }
0x1b4b   : > { %2660 = vmatprep.mubr.bf16.mxu1 %v3502_v48  ;;  %2629 = vmatpush1.bf16.msra.mxu1 %v3378_v45 }
0x1b4c   : > { %2630 = vmatprep.subr.bf16.mxu1 %v3383_v18 }
0x1b4f   : > { %2631 = vmatpush1.bf16.msra.mxu1 %v3381_v49 }
0x1b50   : > { %3105 = vmatprep.subr.bf16.mxu1 %v3384_v50 }
0x1c1d   : > { %v2447_v17 = vpop.f32.mrb[52].mxu1 }
0x1c1e   : > { %v2448_v19 = vadd.f32 %v2989_v16, %v2447_v17  ;;  %v3313_v20 = vpop.f32.mrb[53].mxu1  ;;  %v3396_v16 = vld [vmem:[%s4128_s18 + $0x70] sm:$0xff]  }
0x1c1f   : > { %v2450_v21 = vpop.f32.mrb[54].mxu1  ;;  %v3397_v17 = vld [vmem:[%s4128_s18 + $0x30] sm:$0xff]   ;;  %v3399_v20 = vld [vmem:[%s4128_s18 + $0x38] sm:$0xff]  }
0x1c20   : > { %v2453_v22 = vmul.f32 %v2448_v19, %v2448_v19  ;;  %v3314_v23 = vpop.f32.mrb[55].mxu1  ;;  %v2615_v21 = vlaneseq }
0x1c22   : > { %v2454_v25 = vmul.f32 %v2453_v22, %v2448_v19  ;;  %v2616_v22 = vshrl.u32 %v2615_v21, 7 }
0x1c24   : > { %v2455_v24 = vmul.f32 0.044715, %v2454_v25  ;;  %v2617_v23 = vsub.s32 0, %v2616_v22  ;;  %v2593_v25 = vld [vmem:[%s4127_s17] sm:$0x3] }
0x1c26   : > { %v2456_v26 = vadd.f32 %v2455_v24, %v2448_v19  ;;  %v2621_v24 = vsub.s32 1, %v2616_v22 }
0x1c28   : > { %v2457_v27 = vmul.f32 0.7978846, %v2456_v26  ;;  %v2618_v26 = vrot.slane %v2593_v25, %v2617_v23 }
0x1c2a   : > { %3442 = vtanh.f32 %v2457_v27  ;;  %v2622_v27 = vrot.slane %v2593_v25, %v2621_v24 }
0x1c34   : > { %v3443_v8 = vpop.eup %3442 }
0x1c35   : > { %v2459_v28 = vadd.f32 1.0, %v3443_v8 }
0x1c37   : > { %v2460_v29 = vmul.f32 0.5, %v2459_v28 }
0x1c39   : > { %v2461_v30 = vmul.f32 %v2460_v29, %v2448_v19  ;;  %v3398_v19 = vld [vmem:[%s4128_s18 + $0x78] sm:$0xff]  }
0x1c3b   : > { %v2462_v31 = vpack.c.bf16 %v2461_v30, %v2461_v30 }
0x1c3d   : > { %3324 = vmatmul.mubr.msk.bf16.vlgmr.msra.gmra.mrb[60].mxu0 %vm1557_vm4, %v2462_v31 }
0x1d10   : > { %v2541_v34 = vpop.f32.mrb[60].mxu0 }
0x1d11   : > { %v2542_v32 = vadd.f32 %v3002_v33, %v2541_v34  ;;  %v3325_v35 = vpop.f32.mrb[61].mxu0 }
0x1d12   : > { %v2544_v36 = vpop.f32.mrb[62].mxu0 }
0x1d13   : > { %v3326_v37 = vpop.f32.mrb[63].mxu0  ;;  %v2547_v46 = vadd.f32 %v2542_v32, %v2383_v10  ;;  %v3390_v10 = vld [vmem:[%s4128_s18 + $0x58] sm:$0xff]  }
0x1d15   : > { %v2552_v38 = vsel %vm656_vm0, %v2547_v46, 0.0 }
0x1d16   : > { %2553 = vadd.xlane.f32.xlu1 %v2552_v38 }
0x1da3   : > { %v2554_v40 = vpop.xlane.xlu1 %2553 }
0x1da4   : > { %v2555_v41 = vmul.f32 0.03125, %v2554_v40  ;;  %v2709_v40 = vld [vmem:[%s4129_s19] sm:$0x1] }
0x1da6   : > { %v2556_v42 = vsub.f32 %v2547_v46, %v2555_v41 }
0x1da8   : > { %v2557_v43 = vmul.f32 %v2556_v42, %v2556_v42 }
0x1daa   : > { %v2558_v44 = vsel %vm656_vm0, %v2557_v43, 0.0 }
0x1dab   : > { %2559 = vadd.xlane.f32.xlu1 %v2558_v44 }
0x1e38   : > { %v2560_v51 = vpop.xlane.xlu1 %2559 }
0x1e39   : > { %v2561_v52 = vmul.f32 0.03125, %v2560_v51 }
0x1e3b   : > { %v2562_v53 = vadd.f32 1e-12, %v2561_v52 }
0x1e3d   : > { %3444 = vrsqrt.f32 %v2562_v53 }
0x1e47   : > { %v3445_v54 = vpop.eup %3444 }
0x1e48   : > { %v2564_v56 = vmul.f32 %v3445_v54, %v2556_v42 }
0x1e4a   : > { %v2571_v58 = vmul.f32 %v3010_v55, %v2564_v56 }
0x1e4c   : > { %v2578_v59 = vadd.f32 %v3011_v57, %v2571_v58 }
0x1e4e   : > { %v2579_v60 = vsel %vm656_vm0, %v2578_v59, 0.0 }
0x1e4f   : > { %v2580_v61 = vrot.slane %v2579_v60, 4 }
0x1e51   : > { %v2581_v62 = vadd.f32 %v2580_v61, %v2579_v60 }
0x1e53   : > { %v2582_v63 = vrot.slane %v2581_v62, 2 }
0x1e55   : > { %v2583_v0 = vadd.f32 %v2582_v63, %v2581_v62 }
0x1e57   : > { %v2584_v1 = vrot.slane %v2583_v0, 1 }
0x1e59   : > { %v2585_v39 = vadd.f32 %v2584_v1, %v2583_v0 }
0x1e5b   : > { %v2587_v2 = vmul.f32 0.125, %v2585_v39 }
0x1e5d   : > { %v2588_v4 = vpack.c.bf16 %v2587_v2, %v2587_v2 }
0x1e5f   : > { %3016 = vmatmul.mubr.msk.bf16.vlgmr.msra.gmra.mrb[56].mxu1 %vm656_vm0, %v2588_v4 }
0x1e60   : > { %3106 = vmatpush3.bf16.msra.mxu1 %v3385_v3 }
0x1e61   : > { %3107 = vmatprep.subr.bf16.mxu1 %v3386_v5 }
0x1e64   : > { %3108 = vmatpush3.bf16.msra.mxu1 %v3387_v6 }
0x1e65   : > { %3109 = vmatprep.subr.bf16.mxu1 %v3388_v7 }
0x1e68   : > { %3110 = vmatpush3.bf16.msra.mxu1 %v3389_v9 }
0x1e69   : > { %3111 = vmatprep.subr.bf16.mxu1 %v3390_v10 }
0x1e6c   : > { %3112 = vmatpush3.bf16.msra.mxu1 %v3391_v11 }
0x1e6d   : > { %3113 = vmatprep.subr.bf16.mxu1 %v3392_v12 }
0x1e70   : > { %3114 = vmatpush3.bf16.msra.mxu1 %v3393_v13 }
0x1e71   : > { %3115 = vmatprep.subr.bf16.mxu1 %v3394_v14 }
0x1e74   : > { %3116 = vmatpush3.bf16.msra.mxu1 %v3395_v15 }
0x1e75   : > { %3117 = vmatprep.subr.bf16.mxu1 %v3396_v16 }
0x1e78   : > { %3118 = vmatpush3.bf16.msra.mxu1 %v3397_v17 }
0x1e79   : > { %3119 = vmatprep.subr.bf16.mxu1 %v3398_v19 }
0x1e7c   : > { %3120 = vmatpush3.bf16.msra.mxu1 %v3399_v20 }
0x1f32   : > { %v2662_v8 = vpop.f32.mrb[56].mxu1 }
0x1f33   : > { %v2663_v28 = vadd.f32 %v2662_v8, %v2618_v26  ;;  %v2664_v29 = vpop.f32.mrb[57].mxu1 }
0x1f34   : > { %v2665_v30 = vadd.f32 %v2664_v29, %v2622_v27  ;;  %v2666_v31 = vpop.f32.mrb[58].mxu1 }
0x1f35   : > { %vm2669_vm5 = vcmp.gt.f32.partialorder %v2663_v28, 0.0  ;;  %v2671_v33 = vmul.f32 0.01, %v2663_v28  ;;  %v2667_v34 = vpop.f32.mrb[59].mxu1 }
0x1f36   : > { %vm2670_vm6 = vcmp.gt.f32.partialorder %v2665_v30, 0.0  ;;  %v2672_v32 = vmul.f32 0.01, %v2665_v30 }
0x1f37   : > { %v2673_v35 = vsel %vm2669_vm5, %v2663_v28, %v2671_v33 }
0x1f38   : > { %v2674_v36 = vsel %vm2670_vm6, %v2665_v30, %v2672_v32  ;;  %v2675_v46 = vpack.c.bf16 %v2673_v35, %v2673_v35 }
0x1f39   : > { %v2676_v37 = vpack.c.bf16 %v2674_v36, %v2674_v36 }
0x1f3b   : > { %2838 = vmatprep.mubr.bf16.mxu1 %v2676_v37 }
0x1f3c   : > { %2839 = vmatmul.mubr.bf16.vlgmr.msra.gmra.mrb[60].mxu1 %v2675_v46 }
0x200f   : > { %v3121_v38 = vpop.f32.mrb[60].mxu1 }
0x2010   : > { %v3122_v41 = vpop.f32.mrb[61].mxu1 }
0x2011   : > { %v3123_v42 = vadd.f32 %v3122_v41, %v3121_v38  ;;  %v3124_v43 = vpop.f32.mrb[62].mxu1 }
0x2012   : > { %v3125_v44 = vpop.f32.mrb[63].mxu1 }
0x2013   : > { %v2841_v45 = vadd.f32 %v3123_v42, %v2709_v40 }
0x2015   : > { %2846 = vst [vmem:[%s651_s30] sm:$0x1] %v2841_v45 }
0x2016 PF: > { %s31_s1 = sadd.s32 1, %s3484_s1  }
0x2017   : > { %p28_p3 = scmp.ge.s32.totalorder %s31_s1, 4  }
0x2019   :  { %30 = sbr.rel (!%p28_p3) target bundleno = 7 (0x7), region = 150 }
0x2020   :  { %2864 = vsyncpa [#allocation3], 1 }
0x2021   :  { %2866 = vsyncpa [#allocation3 + $0x1], 1 }

</bundles_post_ra>
